<compile_context>
chip_gen: v6e
topology: v6e:2x2x1
jax: 0.10.0
libtpu: 0.0.40
codegen_flags: <defaults>
</compile_context>

<pallas_src>
import jax
import jax.numpy as jnp
from jax.experimental import pallas as pl
from jax.experimental.pallas import tpu as pltpu

# Small synthetic sizes
T, B, S, H, A, I = 6, 2, 8, 32, 32, 16   # decode steps, batch, src-seq, hidden, attn dim, input dim


# ---------------------------------------------------------------------------
# Fused multi-step decode kernel. Per step:
#   dec_proj|gates_h = h @ [w_dec|w_hh]                      (the ONLY MXU call)
#   energy  = sum_A tanh(enc_proj + dec_proj) * w_out        (lane reduction)
#   e       = exp(energy - max)                               (softmax numerator)
#   gates_att = (sum_s e * enc_att) * 1/sum_s e               (VPU + sublane reduce)
#   gates_x = gates_x_in[t] + gates_att                       (precomputed x-path)
#   h       = GRU gate update;  out[t] = h
# Whole problem fits in VMEM, so this is one program (no grid).
# ---------------------------------------------------------------------------
def _attn_gru_decode_kernel(
    gx_ref,     # [T, B, 3H]      precomputed inputs @ w_ihx + b_ih
    h0_ref,     # [B, H]          initial decoder state
    enc_ref,    # [B, S, A+3H]    lanes [0:A) = enc_proj, lanes [A:) = encoded @ w_iha
    w_ref,      # [H+2, A+3H]     rows [0:H) = [w_dec|w_hh], row H = [b_dec|b_hh], row H+1 = [w_out|0]
    out_ref,    # [T, B, H]
):
    T_ = gx_ref.shape[0]
    Hh = h0_ref.shape[1]
    A_ = w_ref.shape[1] - 3 * Hh

    # Hoisted loads: everything step-invariant stays in vregs/VMEM for all T steps.
    enc_slab = enc_ref[...]
    enc_proj = enc_slab[..., :A_]          # [B, S, A]
    enc_att = enc_slab[..., A_:]           # [B, S, 3H]
    wsl = w_ref[...]
    w_hf = wsl[:Hh, :]                     # [H, A+3H]
    b_hf = wsl[Hh:Hh + 1, :]               # [1, A+3H]
    w_out = wsl[Hh + 1:Hh + 2, :A_]        # [1, A]

    def step(t, h):
        # Single lane-dense MXU call per step: [B, A+3H] = [B, 128].
        hp = jnp.dot(h, w_hf, preferred_element_type=jnp.float32) + b_hf
        dec_proj = hp[:, :A_]              # [B, A]
        gates_h = hp[:, A_:]               # [B, 3H]

        # Bahdanau energies; Linear(A, 1) realized as a lane reduction.
        # (b_out dropped: constant per row, cancelled by the softmax.)
        energy = jnp.sum(
            jnp.tanh(enc_proj + dec_proj[:, None, :]) * w_out[None, :, :], axis=-1
        )                                                              # [B, S]
        energy = energy - jnp.max(energy, axis=1, keepdims=True)
        e = jnp.exp(energy)                                            # [B, S]
        inv = pl.reciprocal(jnp.sum(e, axis=1, keepdims=True), approx=False)  # [B, 1]

        # Attention contribution to the gates, with attn @ w_iha commuted into the
        # precomputed enc_att: VPU multiply + sublane reduce over S (no MXU).
        gates_att = jnp.sum(enc_att * e[:, :, None], axis=1) * inv     # [B, 3H]

        g = gx_ref[t] + gates_att                                      # [B, 3H]

        # GRU gate update; slices at lane offsets H / 2H are cheap at H=32.
        r = jax.nn.sigmoid(g[:, :Hh] + gates_h[:, :Hh])
        z = jax.nn.sigmoid(g[:, Hh:2 * Hh] + gates_h[:, Hh:2 * Hh])
        n = jnp.tanh(g[:, 2 * Hh:] + r * gates_h[:, 2 * Hh:])
        h_new = (1.0 - z) * n + z * h

        out_ref[t] = h_new          # VMEM-resident; single HBM writeback at the end
        return h_new

    jax.lax.fori_loop(0, T_, step, h0_ref[...], unroll=True)


# ---------------------------------------------------------------------------
# One-time weight repacking (call ONCE at init, outside the jitted decode path).
# ---------------------------------------------------------------------------
def pack_params(params):
    H_ = params["w_hh"].shape[0]
    I_ = params["w_ih"].shape[0] - H_
    w_hf = jnp.concatenate([params["w_dec"], params["w_hh"]], axis=1)     # [H, A+3H]
    b_hf = jnp.concatenate([params["b_dec"], params["b_hh"]], axis=1)     # [1, A+3H]
    w_out_row = jnp.pad(params["w_out"], ((0, 0), (0, 3 * H_)))           # [1, A+3H]
    wslab = jnp.concatenate([w_hf, b_hf, w_out_row], axis=0)              # [H+2, A+3H]
    return {
        "wslab": wslab,
        "w_enc": params["w_enc"], "b_enc": params["b_enc"],
        "w_ihx": params["w_ih"][:I_],          # [I, 3H]
        "w_iha": params["w_ih"][I_:],          # [H, 3H]
        "b_ih": params["b_ih"],                # [1, 3H]
        # b_out intentionally dropped: softmax over S is invariant to it.
    }


def with_attention_decode(inputs_seq, h0, encoded, packed):
    """Runs setup_memory(encoded) then forward(inputs[t], h) for t = 0..T-1.

    Returns the stacked hidden states [T, B, H]; row t equals the module's
    forward(inputs_seq[t], h_{t-1}).
    """
    T_, B_, _ = inputs_seq.shape
    H_ = h0.shape[1]
    S_ = encoded.shape[1]
    A_ = packed["w_enc"].shape[1]

    # Step-invariant precomputes (plain XLA, once per decode call):
    #   setup_memory projection, commuted attention weight, and the full
    #   input-gate projection for all T steps.
    enc_proj = encoded @ packed["w_enc"] + packed["b_enc"]                 # [B, S, A]
    enc_att = encoded @ packed["w_iha"]                                    # [B, S, 3H]
    enc_slab = jnp.concatenate([enc_proj, enc_att], axis=-1)               # [B, S, A+3H] lane-dense
    gates_x_in = (
        jnp.einsum("tbi,ig->tbg", inputs_seq, packed["w_ihx"]) + packed["b_ih"]
    )                                                                      # [T, B, 3H]

    # NOTE(v7x): enc_slab is ~4x the footprint of `encoded` and must stay
    # VMEM-resident for all T steps; at realistic B*S raise vmem_limit_bytes via
    # pltpu.CompilerParams or tile the energy/context stage over S.
    vmem = pl.BlockSpec(memory_space=pltpu.MemorySpace.VMEM)
    return pl.pallas_call(
        _attn_gru_decode_kernel,
        out_shape=jax.ShapeDtypeStruct((T_, B_, H_), jnp.float32),
        in_specs=[vmem] * 4,
        out_specs=vmem,
    )(gates_x_in, h0, enc_slab, packed["wslab"])


# ---------------------------------------------------------------------------
# Pure-JAX reference (mirrors the PyTorch module exactly, step by step).
# ---------------------------------------------------------------------------
def ref_decode(inputs_seq, h0, encoded, params):
    enc_proj = encoded @ params["w_enc"] + params["b_enc"]
    Hh = h0.shape[1]
    h = h0
    outs = []
    for t in range(inputs_seq.shape[0]):
        x = inputs_seq[t]
        dec_proj = h @ params["w_dec"] + params["b_dec"][0]
        proj = enc_proj + dec_proj[:, None, :]
        scores = jnp.tanh(proj) @ params["w_out"][0][:, None] + params["b_out"][0, 0]
        weights = jax.nn.softmax(scores, axis=1)                 # [B, S, 1]
        attention = jnp.sum(encoded * weights, axis=1)           # [B, H]
        cell_in = jnp.concatenate([x, attention], axis=1)
        gx = cell_in @ params["w_ih"] + params["b_ih"][0]
        gh = h @ params["w_hh"] + params["b_hh"][0]
        r = jax.nn.sigmoid(gx[:, :Hh] + gh[:, :Hh])
        z = jax.nn.sigmoid(gx[:, Hh:2 * Hh] + gh[:, Hh:2 * Hh])
        n = jnp.tanh(gx[:, 2 * Hh:] + r * gh[:, 2 * Hh:])
        h = (1.0 - z) * n + z * h
        outs.append(h)
    return jnp.stack(outs, axis=0)


def init_params(key):
    ks = jax.random.split(key, 12)
    u = lambda k, shape, scale: jax.random.uniform(k, shape, jnp.float32, -scale, scale)
    sH, sA, sIH = 1.0 / jnp.sqrt(H), 1.0 / jnp.sqrt(A), 1.0 / jnp.sqrt(I + H)
    return {
        # _project_encoder_layer: Linear(H, A)
        "w_enc": u(ks[0], (H, A), sH), "b_enc": u(ks[1], (1, A), sH),
        # _project_decoder_layer: Linear(H, A)
        "w_dec": u(ks[2], (H, A), sH), "b_dec": u(ks[3], (1, A), sH),
        # _output_layer: Linear(A, 1)  (weight kept as [1, A], bias as [1, 1])
        "w_out": u(ks[4], (1, A), sA), "b_out": u(ks[5], (1, 1), sA),
        # GRUCell(I+H, H): weights stored transposed [in, 3H]
        "w_ih": u(ks[6], (I + H, 3 * H), sIH), "b_ih": u(ks[7], (1, 3 * H), sH),
        "w_hh": u(ks[8], (H, 3 * H), sH), "b_hh": u(ks[9], (1, 3 * H), sH),
    }


if __name__ == "__main__":
    key = jax.random.PRNGKey(0)
    kp, k1, k2, k3 = jax.random.split(key, 4)
    params = init_params(kp)
    packed = pack_params(params)          # one-time repack, outside the jitted path

    encoded = jax.random.normal(k1, (B, S, H), jnp.float32)      # encoder memory
    inputs_seq = jax.random.normal(k2, (T, B, I), jnp.float32)   # decoder step inputs
    h0 = jax.random.normal(k3, (B, H), jnp.float32)              # initial decoder state

    decode = jax.jit(with_attention_decode)
    h_all = decode(inputs_seq, h0, encoded, packed)              # [T, B, H]
    h_all = jax.block_until_ready(h_all)

    expected = ref_decode(inputs_seq, h0, encoded, params)
    assert jnp.allclose(h_all, expected, atol=1e-4, rtol=1e-4), "mismatch vs reference"
    print("KERNEL_OK")
</pallas_src>

<mosaic_0001>
module attributes {stable_mosaic.version = 11 : i64} {
  func.func @_attn_gru_decode_kernel(%arg0: memref<6x2x96xf32, #tpu.memory_space<vmem>>, %arg1: memref<2x32xf32, #tpu.memory_space<vmem>>, %arg2: memref<2x8x128xf32, #tpu.memory_space<vmem>>, %arg3: memref<34x128xf32, #tpu.memory_space<vmem>>, %arg4: memref<6x2x32xf32, #tpu.memory_space<vmem>>) attributes {dimension_semantics = [], scalar_prefetch = 0 : i64, scratch_operands = 0 : i64, tpu.core_type = #tpu.core_type<tc>} {
    %c0 = arith.constant 0 : index
    %c0_0 = arith.constant 0 : index
    %c0_1 = arith.constant 0 : index
    %0 = vector.load %arg2[%c0, %c0_0, %c0_1] : memref<2x8x128xf32, #tpu.memory_space<vmem>>, vector<2x8x128xf32>
    %1 = vector.extract_strided_slice %0 {offsets = [0, 0, 0], sizes = [2, 8, 32], strides = [1, 1, 1]} : vector<2x8x128xf32> to vector<2x8x32xf32>
    %2 = vector.extract_strided_slice %0 {offsets = [0, 0, 32], sizes = [2, 8, 96], strides = [1, 1, 1]} : vector<2x8x128xf32> to vector<2x8x96xf32>
    %c0_2 = arith.constant 0 : index
    %c0_3 = arith.constant 0 : index
    %3 = vector.load %arg3[%c0_2, %c0_3] : memref<34x128xf32, #tpu.memory_space<vmem>>, vector<34x128xf32>
    %4 = vector.extract_strided_slice %3 {offsets = [0, 0], sizes = [32, 128], strides = [1, 1]} : vector<34x128xf32> to vector<32x128xf32>
    %5 = vector.extract_strided_slice %3 {offsets = [32, 0], sizes = [1, 128], strides = [1, 1]} : vector<34x128xf32> to vector<1x128xf32>
    %6 = vector.extract_strided_slice %3 {offsets = [33, 0], sizes = [1, 32], strides = [1, 1]} : vector<34x128xf32> to vector<1x32xf32>
    %c0_4 = arith.constant 0 : index
    %c0_5 = arith.constant 0 : index
    %7 = vector.load %arg1[%c0_4, %c0_5] : memref<2x32xf32, #tpu.memory_space<vmem>>, vector<2x32xf32>
    %c0_i32 = arith.constant 0 : i32
    %cst = arith.constant dense<0.000000e+00> : vector<2x128xf32>
    %8 = tpu.matmul %7, %4, %cst {dimension_numbers = #tpu.dot_dimension_numbers<[1], [0], [0], [1], [0, 0, 1, 1], [], []>} : vector<2x32xf32>, vector<32x128xf32>, vector<2x128xf32> -> vector<2x128xf32>
    %9 = vector.broadcast %5 : vector<1x128xf32> to vector<2x128xf32>
    %10 = arith.addf %8, %9 : vector<2x128xf32>
    %11 = vector.extract_strided_slice %10 {offsets = [0, 0], sizes = [2, 32], strides = [1, 1]} : vector<2x128xf32> to vector<2x32xf32>
    %12 = vector.extract_strided_slice %10 {offsets = [0, 32], sizes = [2, 96], strides = [1, 1]} : vector<2x128xf32> to vector<2x96xf32>
    %13 = vector.shape_cast %11 : vector<2x32xf32> to vector<2x1x32xf32>
    %14 = vector.broadcast %13 : vector<2x1x32xf32> to vector<2x8x32xf32>
    %15 = arith.addf %1, %14 : vector<2x8x32xf32>
    %16 = math.tanh %15 : vector<2x8x32xf32>
    %17 = vector.shape_cast %6 : vector<1x32xf32> to vector<1x1x32xf32>
    %18 = vector.broadcast %17 : vector<1x1x32xf32> to vector<2x8x32xf32>
    %19 = arith.mulf %16, %18 : vector<2x8x32xf32>
    %cst_6 = arith.constant dense<0.000000e+00> : vector<2x8xf32>
    %20 = vector.multi_reduction <add>, %19, %cst_6 [2] : vector<2x8x32xf32> to vector<2x8xf32>
    %cst_7 = arith.constant dense<0xFF800000> : vector<2xf32>
    %21 = vector.multi_reduction <maximumf>, %20, %cst_7 [1] : vector<2x8xf32> to vector<2xf32>
    %22 = vector.shape_cast %21 : vector<2xf32> to vector<2x1xf32>
    %23 = vector.broadcast %22 : vector<2x1xf32> to vector<2x8xf32>
    %24 = arith.subf %20, %23 : vector<2x8xf32>
    %25 = math.exp %24 : vector<2x8xf32>
    %cst_8 = arith.constant dense<0.000000e+00> : vector<2xf32>
    %26 = vector.multi_reduction <add>, %25, %cst_8 [1] : vector<2x8xf32> to vector<2xf32>
    %27 = vector.shape_cast %26 : vector<2xf32> to vector<2x1xf32>
    %28 = tpu.reciprocal %27 : vector<2x1xf32> -> vector<2x1xf32>
    %29 = vector.shape_cast %25 : vector<2x8xf32> to vector<2x8x1xf32>
    %30 = vector.broadcast %29 : vector<2x8x1xf32> to vector<2x8x96xf32>
    %31 = arith.mulf %2, %30 : vector<2x8x96xf32>
    %cst_9 = arith.constant dense<0.000000e+00> : vector<2x96xf32>
    %32 = vector.multi_reduction <add>, %31, %cst_9 [1] : vector<2x8x96xf32> to vector<2x96xf32>
    %33 = vector.broadcast %28 : vector<2x1xf32> to vector<2x96xf32>
    %34 = arith.mulf %32, %33 : vector<2x96xf32>
    %35 = arith.index_cast %c0_i32 : i32 to index
    %c0_10 = arith.constant 0 : index
    %c0_11 = arith.constant 0 : index
    %36 = vector.load %arg0[%35, %c0_10, %c0_11] : memref<6x2x96xf32, #tpu.memory_space<vmem>>, vector<1x2x96xf32>
    %37 = vector.shape_cast %36 : vector<1x2x96xf32> to vector<2x96xf32>
    %38 = arith.addf %37, %34 : vector<2x96xf32>
    %39 = vector.extract_strided_slice %38 {offsets = [0, 0], sizes = [2, 32], strides = [1, 1]} : vector<2x96xf32> to vector<2x32xf32>
    %40 = vector.extract_strided_slice %12 {offsets = [0, 0], sizes = [2, 32], strides = [1, 1]} : vector<2x96xf32> to vector<2x32xf32>
    %41 = arith.addf %39, %40 : vector<2x32xf32>
    %42 = arith.negf %41 : vector<2x32xf32>
    %43 = math.exp %42 : vector<2x32xf32>
    %cst_12 = arith.constant 1.000000e+00 : f32
    %44 = vector.broadcast %cst_12 : f32 to vector<2x32xf32>
    %45 = arith.addf %44, %43 : vector<2x32xf32>
    %46 = arith.divf %44, %45 : vector<2x32xf32>
    %47 = vector.extract_strided_slice %38 {offsets = [0, 32], sizes = [2, 32], strides = [1, 1]} : vector<2x96xf32> to vector<2x32xf32>
    %48 = vector.extract_strided_slice %12 {offsets = [0, 32], sizes = [2, 32], strides = [1, 1]} : vector<2x96xf32> to vector<2x32xf32>
    %49 = arith.addf %47, %48 : vector<2x32xf32>
    %50 = arith.negf %49 : vector<2x32xf32>
    %51 = math.exp %50 : vector<2x32xf32>
    %cst_13 = arith.constant 1.000000e+00 : f32
    %52 = vector.broadcast %cst_13 : f32 to vector<2x32xf32>
    %53 = arith.addf %52, %51 : vector<2x32xf32>
    %54 = arith.divf %52, %53 : vector<2x32xf32>
    %55 = vector.extract_strided_slice %38 {offsets = [0, 64], sizes = [2, 32], strides = [1, 1]} : vector<2x96xf32> to vector<2x32xf32>
    %56 = vector.extract_strided_slice %12 {offsets = [0, 64], sizes = [2, 32], strides = [1, 1]} : vector<2x96xf32> to vector<2x32xf32>
    %57 = arith.mulf %46, %56 : vector<2x32xf32>
    %58 = arith.addf %55, %57 : vector<2x32xf32>
    %59 = math.tanh %58 : vector<2x32xf32>
    %cst_14 = arith.constant 1.000000e+00 : f32
    %60 = vector.broadcast %cst_14 : f32 to vector<2x32xf32>
    %61 = arith.subf %60, %54 : vector<2x32xf32>
    %62 = arith.mulf %61, %59 : vector<2x32xf32>
    %63 = arith.mulf %54, %7 : vector<2x32xf32>
    %64 = arith.addf %62, %63 : vector<2x32xf32>
    %65 = arith.index_cast %c0_i32 : i32 to index
    %c0_15 = arith.constant 0 : index
    %c0_16 = arith.constant 0 : index
    %66 = vector.load %arg4[%65, %c0_15, %c0_16] : memref<6x2x32xf32, #tpu.memory_space<vmem>>, vector<1x2x32xf32>
    %67 = vector.shape_cast %66 : vector<1x2x32xf32> to vector<2x32xf32>
    %68 = vector.shape_cast %64 : vector<2x32xf32> to vector<1x2x32xf32>
    tpu.vector_store %arg4[%65, %c0_15, %c0_16], %68 {strides = array<i32>} : memref<6x2x32xf32, #tpu.memory_space<vmem>>, vector<1x2x32xf32>,
    %c1_i32 = arith.constant 1 : i32
    %cst_17 = arith.constant dense<0.000000e+00> : vector<2x128xf32>
    %69 = tpu.matmul %64, %4, %cst_17 {dimension_numbers = #tpu.dot_dimension_numbers<[1], [0], [0], [1], [0, 0, 1, 1], [], []>} : vector<2x32xf32>, vector<32x128xf32>, vector<2x128xf32> -> vector<2x128xf32>
    %70 = vector.broadcast %5 : vector<1x128xf32> to vector<2x128xf32>
    %71 = arith.addf %69, %70 : vector<2x128xf32>
    %72 = vector.extract_strided_slice %71 {offsets = [0, 0], sizes = [2, 32], strides = [1, 1]} : vector<2x128xf32> to vector<2x32xf32>
    %73 = vector.extract_strided_slice %71 {offsets = [0, 32], sizes = [2, 96], strides = [1, 1]} : vector<2x128xf32> to vector<2x96xf32>
    %74 = vector.shape_cast %72 : vector<2x32xf32> to vector<2x1x32xf32>
    %75 = vector.broadcast %74 : vector<2x1x32xf32> to vector<2x8x32xf32>
    %76 = arith.addf %1, %75 : vector<2x8x32xf32>
    %77 = math.tanh %76 : vector<2x8x32xf32>
    %78 = vector.shape_cast %6 : vector<1x32xf32> to vector<1x1x32xf32>
    %79 = vector.broadcast %78 : vector<1x1x32xf32> to vector<2x8x32xf32>
    %80 = arith.mulf %77, %79 : vector<2x8x32xf32>
    %cst_18 = arith.constant dense<0.000000e+00> : vector<2x8xf32>
    %81 = vector.multi_reduction <add>, %80, %cst_18 [2] : vector<2x8x32xf32> to vector<2x8xf32>
    %cst_19 = arith.constant dense<0xFF800000> : vector<2xf32>
    %82 = vector.multi_reduction <maximumf>, %81, %cst_19 [1] : vector<2x8xf32> to vector<2xf32>
    %83 = vector.shape_cast %82 : vector<2xf32> to vector<2x1xf32>
    %84 = vector.broadcast %83 : vector<2x1xf32> to vector<2x8xf32>
    %85 = arith.subf %81, %84 : vector<2x8xf32>
    %86 = math.exp %85 : vector<2x8xf32>
    %cst_20 = arith.constant dense<0.000000e+00> : vector<2xf32>
    %87 = vector.multi_reduction <add>, %86, %cst_20 [1] : vector<2x8xf32> to vector<2xf32>
    %88 = vector.shape_cast %87 : vector<2xf32> to vector<2x1xf32>
    %89 = tpu.reciprocal %88 : vector<2x1xf32> -> vector<2x1xf32>
    %90 = vector.shape_cast %86 : vector<2x8xf32> to vector<2x8x1xf32>
    %91 = vector.broadcast %90 : vector<2x8x1xf32> to vector<2x8x96xf32>
    %92 = arith.mulf %2, %91 : vector<2x8x96xf32>
    %cst_21 = arith.constant dense<0.000000e+00> : vector<2x96xf32>
    %93 = vector.multi_reduction <add>, %92, %cst_21 [1] : vector<2x8x96xf32> to vector<2x96xf32>
    %94 = vector.broadcast %89 : vector<2x1xf32> to vector<2x96xf32>
    %95 = arith.mulf %93, %94 : vector<2x96xf32>
    %96 = arith.index_cast %c1_i32 : i32 to index
    %c0_22 = arith.constant 0 : index
    %c0_23 = arith.constant 0 : index
    %97 = vector.load %arg0[%96, %c0_22, %c0_23] : memref<6x2x96xf32, #tpu.memory_space<vmem>>, vector<1x2x96xf32>
    %98 = vector.shape_cast %97 : vector<1x2x96xf32> to vector<2x96xf32>
    %99 = arith.addf %98, %95 : vector<2x96xf32>
    %100 = vector.extract_strided_slice %99 {offsets = [0, 0], sizes = [2, 32], strides = [1, 1]} : vector<2x96xf32> to vector<2x32xf32>
    %101 = vector.extract_strided_slice %73 {offsets = [0, 0], sizes = [2, 32], strides = [1, 1]} : vector<2x96xf32> to vector<2x32xf32>
    %102 = arith.addf %100, %101 : vector<2x32xf32>
    %103 = arith.negf %102 : vector<2x32xf32>
    %104 = math.exp %103 : vector<2x32xf32>
    %cst_24 = arith.constant 1.000000e+00 : f32
    %105 = vector.broadcast %cst_24 : f32 to vector<2x32xf32>
    %106 = arith.addf %105, %104 : vector<2x32xf32>
    %107 = arith.divf %105, %106 : vector<2x32xf32>
    %108 = vector.extract_strided_slice %99 {offsets = [0, 32], sizes = [2, 32], strides = [1, 1]} : vector<2x96xf32> to vector<2x32xf32>
    %109 = vector.extract_strided_slice %73 {offsets = [0, 32], sizes = [2, 32], strides = [1, 1]} : vector<2x96xf32> to vector<2x32xf32>
    %110 = arith.addf %108, %109 : vector<2x32xf32>
    %111 = arith.negf %110 : vector<2x32xf32>
    %112 = math.exp %111 : vector<2x32xf32>
    %cst_25 = arith.constant 1.000000e+00 : f32
    %113 = vector.broadcast %cst_25 : f32 to vector<2x32xf32>
    %114 = arith.addf %113, %112 : vector<2x32xf32>
    %115 = arith.divf %113, %114 : vector<2x32xf32>
    %116 = vector.extract_strided_slice %99 {offsets = [0, 64], sizes = [2, 32], strides = [1, 1]} : vector<2x96xf32> to vector<2x32xf32>
    %117 = vector.extract_strided_slice %73 {offsets = [0, 64], sizes = [2, 32], strides = [1, 1]} : vector<2x96xf32> to vector<2x32xf32>
    %118 = arith.mulf %107, %117 : vector<2x32xf32>
    %119 = arith.addf %116, %118 : vector<2x32xf32>
    %120 = math.tanh %119 : vector<2x32xf32>
    %cst_26 = arith.constant 1.000000e+00 : f32
    %121 = vector.broadcast %cst_26 : f32 to vector<2x32xf32>
    %122 = arith.subf %121, %115 : vector<2x32xf32>
    %123 = arith.mulf %122, %120 : vector<2x32xf32>
    %124 = arith.mulf %115, %64 : vector<2x32xf32>
    %125 = arith.addf %123, %124 : vector<2x32xf32>
    %126 = arith.index_cast %c1_i32 : i32 to index
    %c0_27 = arith.constant 0 : index
    %c0_28 = arith.constant 0 : index
    %127 = vector.load %arg4[%126, %c0_27, %c0_28] : memref<6x2x32xf32, #tpu.memory_space<vmem>>, vector<1x2x32xf32>
    %128 = vector.shape_cast %127 : vector<1x2x32xf32> to vector<2x32xf32>
    %129 = vector.shape_cast %125 : vector<2x32xf32> to vector<1x2x32xf32>
    tpu.vector_store %arg4[%126, %c0_27, %c0_28], %129 {strides = array<i32>} : memref<6x2x32xf32, #tpu.memory_space<vmem>>, vector<1x2x32xf32>,
    %c2_i32 = arith.constant 2 : i32
    %cst_29 = arith.constant dense<0.000000e+00> : vector<2x128xf32>
    %130 = tpu.matmul %125, %4, %cst_29 {dimension_numbers = #tpu.dot_dimension_numbers<[1], [0], [0], [1], [0, 0, 1, 1], [], []>} : vector<2x32xf32>, vector<32x128xf32>, vector<2x128xf32> -> vector<2x128xf32>
    %131 = vector.broadcast %5 : vector<1x128xf32> to vector<2x128xf32>
    %132 = arith.addf %130, %131 : vector<2x128xf32>
    %133 = vector.extract_strided_slice %132 {offsets = [0, 0], sizes = [2, 32], strides = [1, 1]} : vector<2x128xf32> to vector<2x32xf32>
    %134 = vector.extract_strided_slice %132 {offsets = [0, 32], sizes = [2, 96], strides = [1, 1]} : vector<2x128xf32> to vector<2x96xf32>
    %135 = vector.shape_cast %133 : vector<2x32xf32> to vector<2x1x32xf32>
    %136 = vector.broadcast %135 : vector<2x1x32xf32> to vector<2x8x32xf32>
    %137 = arith.addf %1, %136 : vector<2x8x32xf32>
    %138 = math.tanh %137 : vector<2x8x32xf32>
    %139 = vector.shape_cast %6 : vector<1x32xf32> to vector<1x1x32xf32>
    %140 = vector.broadcast %139 : vector<1x1x32xf32> to vector<2x8x32xf32>
    %141 = arith.mulf %138, %140 : vector<2x8x32xf32>
    %cst_30 = arith.constant dense<0.000000e+00> : vector<2x8xf32>
    %142 = vector.multi_reduction <add>, %141, %cst_30 [2] : vector<2x8x32xf32> to vector<2x8xf32>
    %cst_31 = arith.constant dense<0xFF800000> : vector<2xf32>
    %143 = vector.multi_reduction <maximumf>, %142, %cst_31 [1] : vector<2x8xf32> to vector<2xf32>
    %144 = vector.shape_cast %143 : vector<2xf32> to vector<2x1xf32>
    %145 = vector.broadcast %144 : vector<2x1xf32> to vector<2x8xf32>
    %146 = arith.subf %142, %145 : vector<2x8xf32>
    %147 = math.exp %146 : vector<2x8xf32>
    %cst_32 = arith.constant dense<0.000000e+00> : vector<2xf32>
    %148 = vector.multi_reduction <add>, %147, %cst_32 [1] : vector<2x8xf32> to vector<2xf32>
    %149 = vector.shape_cast %148 : vector<2xf32> to vector<2x1xf32>
    %150 = tpu.reciprocal %149 : vector<2x1xf32> -> vector<2x1xf32>
    %151 = vector.shape_cast %147 : vector<2x8xf32> to vector<2x8x1xf32>
    %152 = vector.broadcast %151 : vector<2x8x1xf32> to vector<2x8x96xf32>
    %153 = arith.mulf %2, %152 : vector<2x8x96xf32>
    %cst_33 = arith.constant dense<0.000000e+00> : vector<2x96xf32>
    %154 = vector.multi_reduction <add>, %153, %cst_33 [1] : vector<2x8x96xf32> to vector<2x96xf32>
    %155 = vector.broadcast %150 : vector<2x1xf32> to vector<2x96xf32>
    %156 = arith.mulf %154, %155 : vector<2x96xf32>
    %157 = arith.index_cast %c2_i32 : i32 to index
    %c0_34 = arith.constant 0 : index
    %c0_35 = arith.constant 0 : index
    %158 = vector.load %arg0[%157, %c0_34, %c0_35] : memref<6x2x96xf32, #tpu.memory_space<vmem>>, vector<1x2x96xf32>
    %159 = vector.shape_cast %158 : vector<1x2x96xf32> to vector<2x96xf32>
    %160 = arith.addf %159, %156 : vector<2x96xf32>
    %161 = vector.extract_strided_slice %160 {offsets = [0, 0], sizes = [2, 32], strides = [1, 1]} : vector<2x96xf32> to vector<2x32xf32>
    %162 = vector.extract_strided_slice %134 {offsets = [0, 0], sizes = [2, 32], strides = [1, 1]} : vector<2x96xf32> to vector<2x32xf32>
    %163 = arith.addf %161, %162 : vector<2x32xf32>
    %164 = arith.negf %163 : vector<2x32xf32>
    %165 = math.exp %164 : vector<2x32xf32>
    %cst_36 = arith.constant 1.000000e+00 : f32
    %166 = vector.broadcast %cst_36 : f32 to vector<2x32xf32>
    %167 = arith.addf %166, %165 : vector<2x32xf32>
    %168 = arith.divf %166, %167 : vector<2x32xf32>
    %169 = vector.extract_strided_slice %160 {offsets = [0, 32], sizes = [2, 32], strides = [1, 1]} : vector<2x96xf32> to vector<2x32xf32>
    %170 = vector.extract_strided_slice %134 {offsets = [0, 32], sizes = [2, 32], strides = [1, 1]} : vector<2x96xf32> to vector<2x32xf32>
    %171 = arith.addf %169, %170 : vector<2x32xf32>
    %172 = arith.negf %171 : vector<2x32xf32>
    %173 = math.exp %172 : vector<2x32xf32>
    %cst_37 = arith.constant 1.000000e+00 : f32
    %174 = vector.broadcast %cst_37 : f32 to vector<2x32xf32>
    %175 = arith.addf %174, %173 : vector<2x32xf32>
    %176 = arith.divf %174, %175 : vector<2x32xf32>
    %177 = vector.extract_strided_slice %160 {offsets = [0, 64], sizes = [2, 32], strides = [1, 1]} : vector<2x96xf32> to vector<2x32xf32>
    %178 = vector.extract_strided_slice %134 {offsets = [0, 64], sizes = [2, 32], strides = [1, 1]} : vector<2x96xf32> to vector<2x32xf32>
    %179 = arith.mulf %168, %178 : vector<2x32xf32>
    %180 = arith.addf %177, %179 : vector<2x32xf32>
    %181 = math.tanh %180 : vector<2x32xf32>
    %cst_38 = arith.constant 1.000000e+00 : f32
    %182 = vector.broadcast %cst_38 : f32 to vector<2x32xf32>
    %183 = arith.subf %182, %176 : vector<2x32xf32>
    %184 = arith.mulf %183, %181 : vector<2x32xf32>
    %185 = arith.mulf %176, %125 : vector<2x32xf32>
    %186 = arith.addf %184, %185 : vector<2x32xf32>
    %187 = arith.index_cast %c2_i32 : i32 to index
    %c0_39 = arith.constant 0 : index
    %c0_40 = arith.constant 0 : index
    %188 = vector.load %arg4[%187, %c0_39, %c0_40] : memref<6x2x32xf32, #tpu.memory_space<vmem>>, vector<1x2x32xf32>
    %189 = vector.shape_cast %188 : vector<1x2x32xf32> to vector<2x32xf32>
    %190 = vector.shape_cast %186 : vector<2x32xf32> to vector<1x2x32xf32>
    tpu.vector_store %arg4[%187, %c0_39, %c0_40], %190 {strides = array<i32>} : memref<6x2x32xf32, #tpu.memory_space<vmem>>, vector<1x2x32xf32>,
    %c3_i32 = arith.constant 3 : i32
    %cst_41 = arith.constant dense<0.000000e+00> : vector<2x128xf32>
    %191 = tpu.matmul %186, %4, %cst_41 {dimension_numbers = #tpu.dot_dimension_numbers<[1], [0], [0], [1], [0, 0, 1, 1], [], []>} : vector<2x32xf32>, vector<32x128xf32>, vector<2x128xf32> -> vector<2x128xf32>
    %192 = vector.broadcast %5 : vector<1x128xf32> to vector<2x128xf32>
    %193 = arith.addf %191, %192 : vector<2x128xf32>
    %194 = vector.extract_strided_slice %193 {offsets = [0, 0], sizes = [2, 32], strides = [1, 1]} : vector<2x128xf32> to vector<2x32xf32>
    %195 = vector.extract_strided_slice %193 {offsets = [0, 32], sizes = [2, 96], strides = [1, 1]} : vector<2x128xf32> to vector<2x96xf32>
    %196 = vector.shape_cast %194 : vector<2x32xf32> to vector<2x1x32xf32>
    %197 = vector.broadcast %196 : vector<2x1x32xf32> to vector<2x8x32xf32>
    %198 = arith.addf %1, %197 : vector<2x8x32xf32>
    %199 = math.tanh %198 : vector<2x8x32xf32>
    %200 = vector.shape_cast %6 : vector<1x32xf32> to vector<1x1x32xf32>
    %201 = vector.broadcast %200 : vector<1x1x32xf32> to vector<2x8x32xf32>
    %202 = arith.mulf %199, %201 : vector<2x8x32xf32>
    %cst_42 = arith.constant dense<0.000000e+00> : vector<2x8xf32>
    %203 = vector.multi_reduction <add>, %202, %cst_42 [2] : vector<2x8x32xf32> to vector<2x8xf32>
    %cst_43 = arith.constant dense<0xFF800000> : vector<2xf32>
    %204 = vector.multi_reduction <maximumf>, %203, %cst_43 [1] : vector<2x8xf32> to vector<2xf32>
    %205 = vector.shape_cast %204 : vector<2xf32> to vector<2x1xf32>
    %206 = vector.broadcast %205 : vector<2x1xf32> to vector<2x8xf32>
    %207 = arith.subf %203, %206 : vector<2x8xf32>
    %208 = math.exp %207 : vector<2x8xf32>
    %cst_44 = arith.constant dense<0.000000e+00> : vector<2xf32>
    %209 = vector.multi_reduction <add>, %208, %cst_44 [1] : vector<2x8xf32> to vector<2xf32>
    %210 = vector.shape_cast %209 : vector<2xf32> to vector<2x1xf32>
    %211 = tpu.reciprocal %210 : vector<2x1xf32> -> vector<2x1xf32>
    %212 = vector.shape_cast %208 : vector<2x8xf32> to vector<2x8x1xf32>
    %213 = vector.broadcast %212 : vector<2x8x1xf32> to vector<2x8x96xf32>
    %214 = arith.mulf %2, %213 : vector<2x8x96xf32>
    %cst_45 = arith.constant dense<0.000000e+00> : vector<2x96xf32>
    %215 = vector.multi_reduction <add>, %214, %cst_45 [1] : vector<2x8x96xf32> to vector<2x96xf32>
    %216 = vector.broadcast %211 : vector<2x1xf32> to vector<2x96xf32>
    %217 = arith.mulf %215, %216 : vector<2x96xf32>
    %218 = arith.index_cast %c3_i32 : i32 to index
    %c0_46 = arith.constant 0 : index
    %c0_47 = arith.constant 0 : index
    %219 = vector.load %arg0[%218, %c0_46, %c0_47] : memref<6x2x96xf32, #tpu.memory_space<vmem>>, vector<1x2x96xf32>
    %220 = vector.shape_cast %219 : vector<1x2x96xf32> to vector<2x96xf32>
    %221 = arith.addf %220, %217 : vector<2x96xf32>
    %222 = vector.extract_strided_slice %221 {offsets = [0, 0], sizes = [2, 32], strides = [1, 1]} : vector<2x96xf32> to vector<2x32xf32>
    %223 = vector.extract_strided_slice %195 {offsets = [0, 0], sizes = [2, 32], strides = [1, 1]} : vector<2x96xf32> to vector<2x32xf32>
    %224 = arith.addf %222, %223 : vector<2x32xf32>
    %225 = arith.negf %224 : vector<2x32xf32>
    %226 = math.exp %225 : vector<2x32xf32>
    %cst_48 = arith.constant 1.000000e+00 : f32
    %227 = vector.broadcast %cst_48 : f32 to vector<2x32xf32>
    %228 = arith.addf %227, %226 : vector<2x32xf32>
    %229 = arith.divf %227, %228 : vector<2x32xf32>
    %230 = vector.extract_strided_slice %221 {offsets = [0, 32], sizes = [2, 32], strides = [1, 1]} : vector<2x96xf32> to vector<2x32xf32>
    %231 = vector.extract_strided_slice %195 {offsets = [0, 32], sizes = [2, 32], strides = [1, 1]} : vector<2x96xf32> to vector<2x32xf32>
    %232 = arith.addf %230, %231 : vector<2x32xf32>
    %233 = arith.negf %232 : vector<2x32xf32>
    %234 = math.exp %233 : vector<2x32xf32>
    %cst_49 = arith.constant 1.000000e+00 : f32
    %235 = vector.broadcast %cst_49 : f32 to vector<2x32xf32>
    %236 = arith.addf %235, %234 : vector<2x32xf32>
    %237 = arith.divf %235, %236 : vector<2x32xf32>
    %238 = vector.extract_strided_slice %221 {offsets = [0, 64], sizes = [2, 32], strides = [1, 1]} : vector<2x96xf32> to vector<2x32xf32>
    %239 = vector.extract_strided_slice %195 {offsets = [0, 64], sizes = [2, 32], strides = [1, 1]} : vector<2x96xf32> to vector<2x32xf32>
    %240 = arith.mulf %229, %239 : vector<2x32xf32>
    %241 = arith.addf %238, %240 : vector<2x32xf32>
    %242 = math.tanh %241 : vector<2x32xf32>
    %cst_50 = arith.constant 1.000000e+00 : f32
    %243 = vector.broadcast %cst_50 : f32 to vector<2x32xf32>
    %244 = arith.subf %243, %237 : vector<2x32xf32>
    %245 = arith.mulf %244, %242 : vector<2x32xf32>
    %246 = arith.mulf %237, %186 : vector<2x32xf32>
    %247 = arith.addf %245, %246 : vector<2x32xf32>
    %248 = arith.index_cast %c3_i32 : i32 to index
    %c0_51 = arith.constant 0 : index
    %c0_52 = arith.constant 0 : index
    %249 = vector.load %arg4[%248, %c0_51, %c0_52] : memref<6x2x32xf32, #tpu.memory_space<vmem>>, vector<1x2x32xf32>
    %250 = vector.shape_cast %249 : vector<1x2x32xf32> to vector<2x32xf32>
    %251 = vector.shape_cast %247 : vector<2x32xf32> to vector<1x2x32xf32>
    tpu.vector_store %arg4[%248, %c0_51, %c0_52], %251 {strides = array<i32>} : memref<6x2x32xf32, #tpu.memory_space<vmem>>, vector<1x2x32xf32>,
    %c4_i32 = arith.constant 4 : i32
    %cst_53 = arith.constant dense<0.000000e+00> : vector<2x128xf32>
    %252 = tpu.matmul %247, %4, %cst_53 {dimension_numbers = #tpu.dot_dimension_numbers<[1], [0], [0], [1], [0, 0, 1, 1], [], []>} : vector<2x32xf32>, vector<32x128xf32>, vector<2x128xf32> -> vector<2x128xf32>
    %253 = vector.broadcast %5 : vector<1x128xf32> to vector<2x128xf32>
    %254 = arith.addf %252, %253 : vector<2x128xf32>
    %255 = vector.extract_strided_slice %254 {offsets = [0, 0], sizes = [2, 32], strides = [1, 1]} : vector<2x128xf32> to vector<2x32xf32>
    %256 = vector.extract_strided_slice %254 {offsets = [0, 32], sizes = [2, 96], strides = [1, 1]} : vector<2x128xf32> to vector<2x96xf32>
    %257 = vector.shape_cast %255 : vector<2x32xf32> to vector<2x1x32xf32>
    %258 = vector.broadcast %257 : vector<2x1x32xf32> to vector<2x8x32xf32>
    %259 = arith.addf %1, %258 : vector<2x8x32xf32>
    %260 = math.tanh %259 : vector<2x8x32xf32>
    %261 = vector.shape_cast %6 : vector<1x32xf32> to vector<1x1x32xf32>
    %262 = vector.broadcast %261 : vector<1x1x32xf32> to vector<2x8x32xf32>
    %263 = arith.mulf %260, %262 : vector<2x8x32xf32>
    %cst_54 = arith.constant dense<0.000000e+00> : vector<2x8xf32>
    %264 = vector.multi_reduction <add>, %263, %cst_54 [2] : vector<2x8x32xf32> to vector<2x8xf32>
    %cst_55 = arith.constant dense<0xFF800000> : vector<2xf32>
    %265 = vector.multi_reduction <maximumf>, %264, %cst_55 [1] : vector<2x8xf32> to vector<2xf32>
    %266 = vector.shape_cast %265 : vector<2xf32> to vector<2x1xf32>
    %267 = vector.broadcast %266 : vector<2x1xf32> to vector<2x8xf32>
    %268 = arith.subf %264, %267 : vector<2x8xf32>
    %269 = math.exp %268 : vector<2x8xf32>
    %cst_56 = arith.constant dense<0.000000e+00> : vector<2xf32>
    %270 = vector.multi_reduction <add>, %269, %cst_56 [1] : vector<2x8xf32> to vector<2xf32>
    %271 = vector.shape_cast %270 : vector<2xf32> to vector<2x1xf32>
    %272 = tpu.reciprocal %271 : vector<2x1xf32> -> vector<2x1xf32>
    %273 = vector.shape_cast %269 : vector<2x8xf32> to vector<2x8x1xf32>
    %274 = vector.broadcast %273 : vector<2x8x1xf32> to vector<2x8x96xf32>
    %275 = arith.mulf %2, %274 : vector<2x8x96xf32>
    %cst_57 = arith.constant dense<0.000000e+00> : vector<2x96xf32>
    %276 = vector.multi_reduction <add>, %275, %cst_57 [1] : vector<2x8x96xf32> to vector<2x96xf32>
    %277 = vector.broadcast %272 : vector<2x1xf32> to vector<2x96xf32>
    %278 = arith.mulf %276, %277 : vector<2x96xf32>
    %279 = arith.index_cast %c4_i32 : i32 to index
    %c0_58 = arith.constant 0 : index
    %c0_59 = arith.constant 0 : index
    %280 = vector.load %arg0[%279, %c0_58, %c0_59] : memref<6x2x96xf32, #tpu.memory_space<vmem>>, vector<1x2x96xf32>
    %281 = vector.shape_cast %280 : vector<1x2x96xf32> to vector<2x96xf32>
    %282 = arith.addf %281, %278 : vector<2x96xf32>
    %283 = vector.extract_strided_slice %282 {offsets = [0, 0], sizes = [2, 32], strides = [1, 1]} : vector<2x96xf32> to vector<2x32xf32>
    %284 = vector.extract_strided_slice %256 {offsets = [0, 0], sizes = [2, 32], strides = [1, 1]} : vector<2x96xf32> to vector<2x32xf32>
    %285 = arith.addf %283, %284 : vector<2x32xf32>
    %286 = arith.negf %285 : vector<2x32xf32>
    %287 = math.exp %286 : vector<2x32xf32>
    %cst_60 = arith.constant 1.000000e+00 : f32
    %288 = vector.broadcast %cst_60 : f32 to vector<2x32xf32>
    %289 = arith.addf %288, %287 : vector<2x32xf32>
    %290 = arith.divf %288, %289 : vector<2x32xf32>
    %291 = vector.extract_strided_slice %282 {offsets = [0, 32], sizes = [2, 32], strides = [1, 1]} : vector<2x96xf32> to vector<2x32xf32>
    %292 = vector.extract_strided_slice %256 {offsets = [0, 32], sizes = [2, 32], strides = [1, 1]} : vector<2x96xf32> to vector<2x32xf32>
    %293 = arith.addf %291, %292 : vector<2x32xf32>
    %294 = arith.negf %293 : vector<2x32xf32>
    %295 = math.exp %294 : vector<2x32xf32>
    %cst_61 = arith.constant 1.000000e+00 : f32
    %296 = vector.broadcast %cst_61 : f32 to vector<2x32xf32>
    %297 = arith.addf %296, %295 : vector<2x32xf32>
    %298 = arith.divf %296, %297 : vector<2x32xf32>
    %299 = vector.extract_strided_slice %282 {offsets = [0, 64], sizes = [2, 32], strides = [1, 1]} : vector<2x96xf32> to vector<2x32xf32>
    %300 = vector.extract_strided_slice %256 {offsets = [0, 64], sizes = [2, 32], strides = [1, 1]} : vector<2x96xf32> to vector<2x32xf32>
    %301 = arith.mulf %290, %300 : vector<2x32xf32>
    %302 = arith.addf %299, %301 : vector<2x32xf32>
    %303 = math.tanh %302 : vector<2x32xf32>
    %cst_62 = arith.constant 1.000000e+00 : f32
    %304 = vector.broadcast %cst_62 : f32 to vector<2x32xf32>
    %305 = arith.subf %304, %298 : vector<2x32xf32>
    %306 = arith.mulf %305, %303 : vector<2x32xf32>
    %307 = arith.mulf %298, %247 : vector<2x32xf32>
    %308 = arith.addf %306, %307 : vector<2x32xf32>
    %309 = arith.index_cast %c4_i32 : i32 to index
    %c0_63 = arith.constant 0 : index
    %c0_64 = arith.constant 0 : index
    %310 = vector.load %arg4[%309, %c0_63, %c0_64] : memref<6x2x32xf32, #tpu.memory_space<vmem>>, vector<1x2x32xf32>
    %311 = vector.shape_cast %310 : vector<1x2x32xf32> to vector<2x32xf32>
    %312 = vector.shape_cast %308 : vector<2x32xf32> to vector<1x2x32xf32>
    tpu.vector_store %arg4[%309, %c0_63, %c0_64], %312 {strides = array<i32>} : memref<6x2x32xf32, #tpu.memory_space<vmem>>, vector<1x2x32xf32>,
    %c5_i32 = arith.constant 5 : i32
    %cst_65 = arith.constant dense<0.000000e+00> : vector<2x128xf32>
    %313 = tpu.matmul %308, %4, %cst_65 {dimension_numbers = #tpu.dot_dimension_numbers<[1], [0], [0], [1], [0, 0, 1, 1], [], []>} : vector<2x32xf32>, vector<32x128xf32>, vector<2x128xf32> -> vector<2x128xf32>
    %314 = vector.broadcast %5 : vector<1x128xf32> to vector<2x128xf32>
    %315 = arith.addf %313, %314 : vector<2x128xf32>
    %316 = vector.extract_strided_slice %315 {offsets = [0, 0], sizes = [2, 32], strides = [1, 1]} : vector<2x128xf32> to vector<2x32xf32>
    %317 = vector.extract_strided_slice %315 {offsets = [0, 32], sizes = [2, 96], strides = [1, 1]} : vector<2x128xf32> to vector<2x96xf32>
    %318 = vector.shape_cast %316 : vector<2x32xf32> to vector<2x1x32xf32>
    %319 = vector.broadcast %318 : vector<2x1x32xf32> to vector<2x8x32xf32>
    %320 = arith.addf %1, %319 : vector<2x8x32xf32>
    %321 = math.tanh %320 : vector<2x8x32xf32>
    %322 = vector.shape_cast %6 : vector<1x32xf32> to vector<1x1x32xf32>
    %323 = vector.broadcast %322 : vector<1x1x32xf32> to vector<2x8x32xf32>
    %324 = arith.mulf %321, %323 : vector<2x8x32xf32>
    %cst_66 = arith.constant dense<0.000000e+00> : vector<2x8xf32>
    %325 = vector.multi_reduction <add>, %324, %cst_66 [2] : vector<2x8x32xf32> to vector<2x8xf32>
    %cst_67 = arith.constant dense<0xFF800000> : vector<2xf32>
    %326 = vector.multi_reduction <maximumf>, %325, %cst_67 [1] : vector<2x8xf32> to vector<2xf32>
    %327 = vector.shape_cast %326 : vector<2xf32> to vector<2x1xf32>
    %328 = vector.broadcast %327 : vector<2x1xf32> to vector<2x8xf32>
    %329 = arith.subf %325, %328 : vector<2x8xf32>
    %330 = math.exp %329 : vector<2x8xf32>
    %cst_68 = arith.constant dense<0.000000e+00> : vector<2xf32>
    %331 = vector.multi_reduction <add>, %330, %cst_68 [1] : vector<2x8xf32> to vector<2xf32>
    %332 = vector.shape_cast %331 : vector<2xf32> to vector<2x1xf32>
    %333 = tpu.reciprocal %332 : vector<2x1xf32> -> vector<2x1xf32>
    %334 = vector.shape_cast %330 : vector<2x8xf32> to vector<2x8x1xf32>
    %335 = vector.broadcast %334 : vector<2x8x1xf32> to vector<2x8x96xf32>
    %336 = arith.mulf %2, %335 : vector<2x8x96xf32>
    %cst_69 = arith.constant dense<0.000000e+00> : vector<2x96xf32>
    %337 = vector.multi_reduction <add>, %336, %cst_69 [1] : vector<2x8x96xf32> to vector<2x96xf32>
    %338 = vector.broadcast %333 : vector<2x1xf32> to vector<2x96xf32>
    %339 = arith.mulf %337, %338 : vector<2x96xf32>
    %340 = arith.index_cast %c5_i32 : i32 to index
    %c0_70 = arith.constant 0 : index
    %c0_71 = arith.constant 0 : index
    %341 = vector.load %arg0[%340, %c0_70, %c0_71] : memref<6x2x96xf32, #tpu.memory_space<vmem>>, vector<1x2x96xf32>
    %342 = vector.shape_cast %341 : vector<1x2x96xf32> to vector<2x96xf32>
    %343 = arith.addf %342, %339 : vector<2x96xf32>
    %344 = vector.extract_strided_slice %343 {offsets = [0, 0], sizes = [2, 32], strides = [1, 1]} : vector<2x96xf32> to vector<2x32xf32>
    %345 = vector.extract_strided_slice %317 {offsets = [0, 0], sizes = [2, 32], strides = [1, 1]} : vector<2x96xf32> to vector<2x32xf32>
    %346 = arith.addf %344, %345 : vector<2x32xf32>
    %347 = arith.negf %346 : vector<2x32xf32>
    %348 = math.exp %347 : vector<2x32xf32>
    %cst_72 = arith.constant 1.000000e+00 : f32
    %349 = vector.broadcast %cst_72 : f32 to vector<2x32xf32>
    %350 = arith.addf %349, %348 : vector<2x32xf32>
    %351 = arith.divf %349, %350 : vector<2x32xf32>
    %352 = vector.extract_strided_slice %343 {offsets = [0, 32], sizes = [2, 32], strides = [1, 1]} : vector<2x96xf32> to vector<2x32xf32>
    %353 = vector.extract_strided_slice %317 {offsets = [0, 32], sizes = [2, 32], strides = [1, 1]} : vector<2x96xf32> to vector<2x32xf32>
    %354 = arith.addf %352, %353 : vector<2x32xf32>
    %355 = arith.negf %354 : vector<2x32xf32>
    %356 = math.exp %355 : vector<2x32xf32>
    %cst_73 = arith.constant 1.000000e+00 : f32
    %357 = vector.broadcast %cst_73 : f32 to vector<2x32xf32>
    %358 = arith.addf %357, %356 : vector<2x32xf32>
    %359 = arith.divf %357, %358 : vector<2x32xf32>
    %360 = vector.extract_strided_slice %343 {offsets = [0, 64], sizes = [2, 32], strides = [1, 1]} : vector<2x96xf32> to vector<2x32xf32>
    %361 = vector.extract_strided_slice %317 {offsets = [0, 64], sizes = [2, 32], strides = [1, 1]} : vector<2x96xf32> to vector<2x32xf32>
    %362 = arith.mulf %351, %361 : vector<2x32xf32>
    %363 = arith.addf %360, %362 : vector<2x32xf32>
    %364 = math.tanh %363 : vector<2x32xf32>
    %cst_74 = arith.constant 1.000000e+00 : f32
    %365 = vector.broadcast %cst_74 : f32 to vector<2x32xf32>
    %366 = arith.subf %365, %359 : vector<2x32xf32>
    %367 = arith.mulf %366, %364 : vector<2x32xf32>
    %368 = arith.mulf %359, %308 : vector<2x32xf32>
    %369 = arith.addf %367, %368 : vector<2x32xf32>
    %370 = arith.index_cast %c5_i32 : i32 to index
    %c0_75 = arith.constant 0 : index
    %c0_76 = arith.constant 0 : index
    %371 = vector.load %arg4[%370, %c0_75, %c0_76] : memref<6x2x32xf32, #tpu.memory_space<vmem>>, vector<1x2x32xf32>
    %372 = vector.shape_cast %371 : vector<1x2x32xf32> to vector<2x32xf32>
    %373 = vector.shape_cast %369 : vector<2x32xf32> to vector<1x2x32xf32>
    tpu.vector_store %arg4[%370, %c0_75, %c0_76], %373 {strides = array<i32>} : memref<6x2x32xf32, #tpu.memory_space<vmem>>, vector<1x2x32xf32>,
    %c6_i32 = arith.constant 6 : i32
    return
  }
}

</mosaic_0001>

<bundles_post_ra>
// kernel: with_attention_decode.1
= control target key start
LH: loop header
LB: loop body
LE: loop exit
PB: predicated region body
PF: predicated region fallthrough
CT: control target
= control target key end

     0   :  { %v1737_v1 = vmov 0.0   ;;  %vm1738_vm0 = vmmov 0   ;;  %s2171_s0 = inlined_call_operand.vmem [shape: f32[6,2,96], index: 0, kind: input, shape index: {}]   ;;  %s2172_s1 = inlined_call_operand.vmem [shape: f32[2,32], index: 1, kind: input, shape index: {}]   ;;  %s2173_s2 = inlined_call_operand.vmem [shape: f32[2,8,128], index: 2, kind: input, shape index: {}]   ;;  %s2174_s3 = inlined_call_operand.vmem [shape: f32[34,128], index: 3, kind: input, shape index: {}]   ;;  %s2175_s4 = inlined_call_operand.hbm [shape: f32[6,2,32], index: 4, kind: output, shape index: {}]  }
   0x1   :  { %v1774_v0 = vld [vmem:[%s2174_s3 + $0x18] sm:$0xff]  ;;  %1540 = vmatprep.subr.mxu0 %v1737_v1  ;;  %v1780_v2 = vld [vmem:[%s2174_s3 + $0x10] sm:$0xff]  ;;  %1548 = vmatprep.mubr.msk.f32.mxu0 %vm1738_vm0, %v1737_v1 }
   0x2   :  { %1541 = vmatpush3.msra.mxu0 %v1774_v0  ;;  %1551 = vmatprep.subr.mxu1 %v1737_v1 }
   0x3   :  { %9 = vsyncpa [#allocation3], 0  ;;  %1542 = vmatprep.subr.mxu0 %v1737_v1  ;;  %v1790_v3 = vld [vmem:[%s2174_s3 + $0x8] sm:$0xff]  ;;  %1552 = vmatpush3.msra.mxu1 %v1774_v0  ;;  %v1799_v4 = vld [vmem:[%s2174_s3] sm:$0xff]  ;;  %vm30_vm1 = vcmask 261120   ;;  %v26_v6 = vlaneseq  ;;  %vm165_vm2 = vcmask 1041409  }
   0x4   :  { %1543 = vmatpush3.msra.mxu0 %v1780_v2  ;;  %1553 = vmatprep.subr.mxu1 %v1737_v1  ;;  %v1806_v5 = vld [vmem:[%s2172_s1] sm:$0x3]  ;;  %v1739_v8 = vmov 1966171168   ;;  %v1856_v24 = vld [vmem:[%s2173_s2 + $0x8] sm:$0xff]  ;;  %vm168_vm3 = vcmask 58368  }
   0x5   :  { %1544 = vmatprep.subr.mxu0 %v1737_v1  ;;  %1554 = vmatpush3.msra.mxu1 %v1780_v2  ;;  %v27_v7 = vshrl.u32 %v26_v6, 7  ;;  %v106_v9 = vunpack.c.l.s4 %v1739_v8  ;;  %v24_v11 = vld [vmem:[%s2174_s3 + $0x20] sm:$0x3]  ;;  %v156_v36 = vand.u32 127, %v26_v6  ;;  %v1740_v44 = vmov 0   ;;  %s1741_s29 = smov 32  }
   0x6   :  { %1545 = vmatpush3.msra.mxu0 %v1790_v3  ;;  %1555 = vmatprep.subr.mxu1 %v1737_v1  ;;  %v1849_v21 = vld [vmem:[%s2173_s2] sm:$0xff]  ;;  %vm215_vm4 = vcmask 1047808   ;;  %s1742_s30 = smov 96   ;;  %s1743_s7 = smov 64   ;;  %vm280_vm5 = vcmask 254976  }
   0x7   :  { %1546 = vmatprep.subr.mxu0 %v1737_v1  ;;  %1556 = vmatpush3.msra.mxu1 %v1790_v3  ;;  %v1830_v10 = vsub.s32 0, %v27_v7  ;;  %v107_v12 = vunpack.c.0.s8 %v106_v9  ;;  %v1861_v28 = vsub.s32 1, %v27_v7  ;;  %v1870_v38 = vsub.s32 %v156_v36, %v27_v7 }
   0x8   :  { %1547 = vmatpush3.msra.mxu0 %v1799_v4  ;;  %1557 = vmatprep.subr.mxu1 %v1737_v1 }
   0x9   :  { %1549 = vmatmul.mubr.msk.f32.vlgmr.msra.gmra.mxu0 %vm30_vm1, %v1806_v5  ;;  %1558 = vmatpush3.msra.mxu1 %v1799_v4  ;;  %v1836_v13 = vrot.slane %v24_v11, %v1830_v10  ;;  %v1838_v14 = vsub.s32 %v107_v12, %v27_v7  ;;  %v1864_v29 = vrot.slane %v24_v11, %v1861_v28 }
   0xa   :  { %1559 = vmatprep.mubr.msk.f32.mxu1 %vm1738_vm0, %v1737_v1  ;;  %1562 = vmatprep.subr.mxu0 %v1737_v1 }
   0xb   :  { %1563 = vmatpush3.msra.mxu0 %v1774_v0  ;;  %1570 = vmatprep.mubr.msk.f32.mxu0 %vm1738_vm0, %v1737_v1 }
   0xc   :  { %1564 = vmatprep.subr.mxu0 %v1737_v1  ;;  %1573 = vmatprep.subr.mxu1 %v1737_v1 }
   0xd   :  { %1565 = vmatpush3.msra.mxu0 %v1780_v2  ;;  %1616 = vset.pattern.permute.xlu0 %v1740_v44 }
   0xe   :  { %1566 = vmatprep.subr.mxu0 %v1737_v1  ;;  %1615 = vset.pattern.permute.xlu1 %v1740_v44 }
   0xf   :  { %1567 = vmatpush3.msra.mxu0 %v1790_v3 }
  0x10   :  { %1568 = vmatprep.subr.mxu0 %v1737_v1 }
  0x11   :  { %1569 = vmatpush3.msra.mxu0 %v1799_v4 }
  0x12   :  { %1584 = vmatprep.subr.mxu0 %v1737_v1 }
  0xc9   :  { %v100_v15 = vpop.f32.mrf.mxu0 }
  0xca   :  { %v1841_v16 = vadd.f32 %v100_v15, %v1836_v13 }
  0xcb   :  { %v1550_v17 = vpop.f32.mrf.mxu0 }
  0xcc   :  { %v111_v18 = vrot.slane %v1841_v16, %v1838_v14 }
  0xce   :  { %v112_v19 = vcombine.high %v111_v18, %v111_v18  ;;  %v119_v20 = vrot.slane %v111_v18, %v1838_v14 }
  0xd0   :  { %v126_v22 = vrot.slane %v112_v19, %v1838_v14  ;;  %v130_v23 = vrot.slane %v119_v20, %v1830_v10 }
  0xd2   :  { %v134_v25 = vrot.slane %v126_v22, %v1830_v10  ;;  %v137_v26 = vadd.f32 %v130_v23, %v1849_v21 }
  0xd4   :  { %v138_v27 = vadd.f32 %v134_v25, %v1856_v24  ;;  %1617 = vtanh.f32 %v137_v26 }
  0xd6   :  { %1619 = vtanh.f32 %v138_v27 }
  0xe1   :  { %v1618_v30 = vpop.eup %1617 }
  0xe2   :  { %v145_v31 = vmul.f32 %v1618_v30, %v1864_v29 }
  0xe3   :  { %v1620_v32 = vpop.eup %1619 }
  0xe4   :  { %v147_v33 = vsel %vm30_vm1, %v145_v31, 0.0  ;;  %v146_v34 = vmul.f32 %v1620_v32, %v1864_v29 }
  0xe5   :  { %148 = vadd.xlane.f32.xlu0 %v147_v33  ;;  %v236_v33 = vld [vmem:[%s2171_s0] sm:$0x3] }
  0xe6   :  { %v150_v35 = vsel %vm30_vm1, %v146_v34, 0.0 }
  0xe9   :  { %151 = vadd.xlane.f32.xlu0 %v150_v35 }
 0x16e   :  { %v149_v37 = vpop.xlane.xlu0 %148 }
 0x16f   :  { %v160_v40 = vrot.slane %v149_v37, %v1870_v38 }
 0x172   :  { %v152_v39 = vpop.xlane.xlu0 %151 }
 0x173   :  { %v164_v41 = vrot.slane %v152_v39, %v1870_v38 }
 0x175   :  { %v166_v42 = vsel %vm165_vm2, %v164_v41, %v160_v40 }
 0x176   :  { %v169_v43 = vsel %vm168_vm3, %v166_v42, -inf }
 0x177   :  { %170 = vmax.xlane.f32.xlu1 %v169_v43 }
 0x200   :  { %v171_v45 = vpop.xlane.xlu1 %170 }
 0x201   :  { %v176_v46 = vrot.slane %v171_v45, %v1830_v10  ;;  %v180_v47 = vrot.slane %v171_v45, %v1861_v28 }
 0x203   :  { %v183_v48 = vsub.f32 %v149_v37, %v176_v46  ;;  %v184_v49 = vsub.f32 %v152_v39, %v180_v47 }
 0x205   :  { %v185_v50 = vmul.f32 1.442695, %v183_v48  ;;  %v187_v51 = vmul.f32 1.442695, %v184_v49 }
 0x207   :  { %1621 = vpow2.f32 %v185_v50 }
 0x208   :  { %1623 = vpow2.f32 %v187_v51 }
 0x214   :  { %v1622_v52 = vpop.eup %1621 }
 0x215   :  { %v1624_v53 = vpop.eup %1623  ;;  %192 = vperm.xlu1 %1615, %v1622_v52  }
 0x216   :  { %195 = vperm.xlu0 %1616, %v1624_v53  }
 0x290   :  { %v193_v54 = vpop.permute.xlu1 %192 }
 0x291   :  { %v196_v55 = vpop.permute.xlu0 %195  ;;  %v200_v56 = vrot.slane %v193_v54, %v1870_v38  ;;  %v213_v61 = vmul.f32 %v193_v54, %v1849_v21 }
 0x292   :  { %v204_v57 = vrot.slane %v196_v55, %v1870_v38  ;;  %v214_v60 = vmul.f32 %v196_v55, %v1856_v24 }
 0x293   :  { %v216_v63 = vsel %vm215_vm4, %v213_v61, 0.0 }
 0x294   :  { %v205_v58 = vsel %vm165_vm2, %v204_v57, %v200_v56  ;;  %v223_v62 = vsel %vm215_vm4, %v214_v60, 0.0  ;;  %v217_v7 = vrot.slane %v216_v63, 4 }
 0x295   :  { %v207_v59 = vsel %vm168_vm3, %v205_v58, 0.0  ;;  %v224_v6 = vrot.slane %v223_v62, 4 }
 0x296   :  { %208 = vadd.xlane.f32.xlu1 %v207_v59  ;;  %v218_v11 = vadd.f32 %v217_v7, %v216_v63 }
 0x297   :  { %v225_v8 = vadd.f32 %v224_v6, %v223_v62 }
 0x298   :  { %v219_v15 = vrot.slane %v218_v11, 2 }
 0x299   :  { %v226_v12 = vrot.slane %v225_v8, 2 }
 0x29a   :  { %v220_v18 = vadd.f32 %v219_v15, %v218_v11 }
 0x29b   :  { %v227_v17 = vadd.f32 %v226_v12, %v225_v8 }
 0x29c   :  { %v221_v20 = vrot.slane %v220_v18, 1 }
 0x29d   :  { %v228_v19 = vrot.slane %v227_v17, 1 }
 0x29e   :  { %v222_v26 = vadd.f32 %v221_v20, %v220_v18 }
 0x29f   :  { %v229_v23 = vadd.f32 %v228_v19, %v227_v17 }
 0x2a7   :  { %255 = vrot.lane.b32.xlu1 %v1841_v16, %s1741_s29 }
 0x31f   :  { %v209_v9 = vpop.xlane.xlu1 %208 }
 0x320   :  { %1625 = vrcp.f32 %v209_v9 }
 0x323   :  { %v256_v43 = vpop.permute.xlu1 %255 }
 0x32d   :  { %v1626_v22 = vpop.eup %1625 }
 0x32e   :  { %v231_v25 = vrot.slane %v1626_v22, 1  ;;  %v234_v30 = vmul.f32 %v1626_v22, %v222_v26 }
 0x330   :  { %v235_v27 = vmul.f32 %v231_v25, %v229_v23 }
 0x332   :  { %v239_v31 = vrot.slane %v235_v27, 7 }
 0x334   :  { %v240_v32 = vsel %vm165_vm2, %v239_v31, %v234_v30 }
 0x335   :  { %241 = vrot.lane.b32.xlu0 %v240_v32, %s1742_s30 }
 0x339   :  { %245 = vrot.lane.b32.xlu0 %v1841_v16, %s1742_s30 }
 0x3a7   :  { %v242_v34 = vpop.permute.xlu0 %241 }
 0x3a8   :  { %v244_v35 = vadd.f32 %v242_v34, %v236_v33 }
 0x3ab   :  { %v246_v36 = vpop.permute.xlu0 %245 }
 0x3ac   :  { %v248_v37 = vadd.f32 %v246_v36, %v244_v35 }
 0x3ae   :  { %v1494_v39 = vmul.f32 -1.442695, %v248_v37 }
 0x3b0   :  { %1627 = vpow2.f32 %v1494_v39 }
 0x3bd   :  { %v1628_v40 = vpop.eup %1627 }
 0x3be   :  { %v252_v41 = vadd.f32 1.0, %v1628_v40 }
 0x3c0   :  { %1629 = vrcp.f32 %v252_v41 }
 0x3cd   :  { %v1630_v42 = vpop.eup %1629 }
 0x3ce   :  { %v258_v44 = vmul.f32 %v1630_v42, %v256_v43  ;;  %v265_v48 = vsub.f32 1.0, %v1630_v42 }
 0x3d0   :  { %260 = vrot.lane.b32.xlu0 %v258_v44, %s1743_s7 }
 0x442   :  { %v261_v16 = vpop.permute.xlu0 %260 }
 0x443   :  { %v263_v45 = vadd.f32 %v261_v16, %v244_v35 }
 0x445   :  { %1631 = vtanh.f32 %v263_v45 }
 0x452   :  { %v1632_v46 = vpop.eup %1631 }
 0x453   :  { %267 = vrot.lane.b32.xlu0 %v1632_v46, %s1742_s30 }
 0x457   :  { %271 = vrot.lane.b32.xlu0 %v1806_v5, %s1741_s29 }
 0x4c5   :  { %v268_v47 = vpop.permute.xlu0 %267 }
 0x4c6   :  { %v270_v50 = vmul.f32 %v268_v47, %v265_v48 }
 0x4c9   :  { %v272_v49 = vpop.permute.xlu0 %271 }
 0x4ca   :  { %v274_v51 = vmul.f32 %v1630_v42, %v272_v49 }
 0x4cc   :  { %v1899_v52 = vadd.f32 %v274_v51, %v270_v50 }
 0x4ce   :  { %277 = vrot.lane.b32.xlu0 %v1899_v52, %s1742_s30 }
 0x540   :  { %v278_v53 = vpop.permute.xlu0 %277 }
 0x541   :  { %281 = vst.msk [vmem:[#allocation2] sm:$0x3] %vm280_vm5, %v278_v53  ;;  %1560 = vmatmul.mubr.msk.f32.vlgmr.msra.gmra.mxu1 %vm30_vm1, %v278_v53 }
 0x542   :  { %1574 = vmatpush3.msra.mxu1 %v1774_v0  ;;  %1581 = vmatprep.mubr.msk.f32.mxu1 %vm1738_vm0, %v1737_v1 }
 0x543   :  { %1575 = vmatprep.subr.mxu1 %v1737_v1 }
 0x544   :  { %1576 = vmatpush3.msra.mxu1 %v1780_v2 }
 0x545   :  { %1577 = vmatprep.subr.mxu1 %v1737_v1 }
 0x546   :  { %1578 = vmatpush3.msra.mxu1 %v1790_v3 }
 0x547   :  { %1579 = vmatprep.subr.mxu1 %v1737_v1 }
 0x548   :  { %1580 = vmatpush3.msra.mxu1 %v1799_v4 }
 0x549   :  { %1595 = vmatprep.subr.mxu1 %v1737_v1 }
 0x601   :  { %v350_v5 = vpop.f32.mrf.mxu1 }
 0x602   :  { %v1916_v54 = vadd.f32 %v350_v5, %v1836_v13 }
 0x603   :  { %v1561_v55 = vpop.f32.mrf.mxu1 }
 0x604   :  { %v361_v56 = vrot.slane %v1916_v54, %v1838_v14 }
 0x606   :  { %v362_v57 = vcombine.high %v361_v56, %v361_v56  ;;  %v369_v58 = vrot.slane %v361_v56, %v1838_v14 }
 0x608   :  { %v376_v59 = vrot.slane %v362_v57, %v1838_v14  ;;  %v380_v60 = vrot.slane %v369_v58, %v1830_v10 }
 0x60a   :  { %v384_v61 = vrot.slane %v376_v59, %v1830_v10  ;;  %v387_v62 = vadd.f32 %v380_v60, %v1849_v21 }
 0x60c   :  { %v388_v63 = vadd.f32 %v384_v61, %v1856_v24  ;;  %1633 = vtanh.f32 %v387_v62 }
 0x60e   :  { %1635 = vtanh.f32 %v388_v63 }
 0x619   :  { %v1634_v6 = vpop.eup %1633 }
 0x61a   :  { %v391_v7 = vmul.f32 %v1634_v6, %v1864_v29 }
 0x61b   :  { %v1636_v8 = vpop.eup %1635 }
 0x61c   :  { %v393_v9 = vsel %vm30_vm1, %v391_v7, 0.0  ;;  %v392_v11 = vmul.f32 %v1636_v8, %v1864_v29  ;;  %v1496_v7 = vld [vmem:[%s2171_s0 + $0x2] sm:$0x3] }
 0x61d   :  { %394 = vadd.xlane.f32.xlu1 %v393_v9 }
 0x61e   :  { %v396_v12 = vsel %vm30_vm1, %v392_v11, 0.0 }
 0x61f   :  { %397 = vadd.xlane.f32.xlu0 %v396_v12 }
 0x6a6   :  { %v395_v15 = vpop.xlane.xlu1 %394 }
 0x6a7   :  { %v404_v18 = vrot.slane %v395_v15, %v1870_v38 }
 0x6a8   :  { %v398_v17 = vpop.xlane.xlu0 %397 }
 0x6a9   :  { %v408_v19 = vrot.slane %v398_v17, %v1870_v38 }
 0x6ab   :  { %v409_v20 = vsel %vm165_vm2, %v408_v19, %v404_v18 }
 0x6ac   :  { %v411_v22 = vsel %vm168_vm3, %v409_v20, -inf }
 0x6ad   :  { %412 = vmax.xlane.f32.xlu0 %v411_v22 }
 0x736   :  { %v413_v23 = vpop.xlane.xlu0 %412 }
 0x737   :  { %v418_v25 = vrot.slane %v413_v23, %v1830_v10  ;;  %v422_v26 = vrot.slane %v413_v23, %v1861_v28 }
 0x739   :  { %v425_v27 = vsub.f32 %v395_v15, %v418_v25  ;;  %v426_v30 = vsub.f32 %v398_v17, %v422_v26 }
 0x73b   :  { %v427_v31 = vmul.f32 1.442695, %v425_v27  ;;  %v429_v32 = vmul.f32 1.442695, %v426_v30 }
 0x73d   :  { %1637 = vpow2.f32 %v427_v31 }
 0x73e   :  { %1639 = vpow2.f32 %v429_v32 }
 0x74a   :  { %v1638_v33 = vpop.eup %1637 }
 0x74b   :  { %v1640_v34 = vpop.eup %1639  ;;  %434 = vperm.xlu1 %1615, %v1638_v33  }
 0x74c   :  { %437 = vperm.xlu0 %1616, %v1640_v34  }
 0x7c6   :  { %v435_v35 = vpop.permute.xlu1 %434 }
 0x7c7   :  { %v438_v36 = vpop.permute.xlu0 %437  ;;  %v442_v37 = vrot.slane %v435_v35, %v1870_v38  ;;  %v455_v43 = vmul.f32 %v435_v35, %v1849_v21 }
 0x7c8   :  { %v446_v39 = vrot.slane %v438_v36, %v1870_v38  ;;  %v456_v42 = vmul.f32 %v438_v36, %v1856_v24 }
 0x7c9   :  { %v457_v16 = vsel %vm215_vm4, %v455_v43, 0.0 }
 0x7ca   :  { %v447_v40 = vsel %vm165_vm2, %v446_v39, %v442_v37  ;;  %v464_v44 = vsel %vm215_vm4, %v456_v42, 0.0  ;;  %v458_v46 = vrot.slane %v457_v16, 4 }
 0x7cb   :  { %v449_v41 = vsel %vm168_vm3, %v447_v40, 0.0  ;;  %v465_v45 = vrot.slane %v464_v44, 4 }
 0x7cc   :  { %450 = vadd.xlane.f32.xlu1 %v449_v41  ;;  %v459_v49 = vadd.f32 %v458_v46, %v457_v16 }
 0x7cd   :  { %v466_v47 = vadd.f32 %v465_v45, %v464_v44 }
 0x7ce   :  { %v460_v51 = vrot.slane %v459_v49, 2 }
 0x7cf   :  { %v467_v50 = vrot.slane %v466_v47, 2 }
 0x7d0   :  { %v461_v5 = vadd.f32 %v460_v51, %v459_v49 }
 0x7d1   :  { %v468_v53 = vadd.f32 %v467_v50, %v466_v47 }
 0x7d2   :  { %v462_v56 = vrot.slane %v461_v5, 1 }
 0x7d3   :  { %v469_v55 = vrot.slane %v468_v53, 1 }
 0x7d4   :  { %v463_v60 = vadd.f32 %v462_v56, %v461_v5 }
 0x7d5   :  { %v470_v58 = vadd.f32 %v469_v55, %v468_v53 }
 0x855   :  { %v451_v48 = vpop.xlane.xlu1 %450 }
 0x856   :  { %1641 = vrcp.f32 %v451_v48 }
 0x863   :  { %v1642_v57 = vpop.eup %1641 }
 0x864   :  { %v472_v59 = vrot.slane %v1642_v57, 1  ;;  %v475_v62 = vmul.f32 %v1642_v57, %v463_v60 }
 0x866   :  { %v476_v61 = vmul.f32 %v472_v59, %v470_v58 }
 0x868   :  { %v481_v63 = vrot.slane %v476_v61, 7 }
 0x86a   :  { %v482_v6 = vsel %vm165_vm2, %v481_v63, %v475_v62 }
 0x86b   :  { %483 = vrot.lane.b32.xlu0 %v482_v6, %s1742_s30 }
 0x86f   :  { %487 = vrot.lane.b32.xlu0 %v1916_v54, %s1742_s30 }
 0x873   :  { %497 = vrot.lane.b32.xlu0 %v1916_v54, %s1741_s29 }
 0x8dd   :  { %v484_v8 = vpop.permute.xlu0 %483 }
 0x8de   :  { %v486_v9 = vadd.f32 %v1496_v7, %v484_v8 }
 0x8e1   :  { %v488_v11 = vpop.permute.xlu0 %487 }
 0x8e2   :  { %v490_v12 = vadd.f32 %v488_v11, %v486_v9 }
 0x8e4   :  { %v1497_v15 = vmul.f32 -1.442695, %v490_v12 }
 0x8e5   :  { %v498_v20 = vpop.permute.xlu0 %497 }
 0x8e6   :  { %1643 = vpow2.f32 %v1497_v15 }
 0x8f3   :  { %v1644_v17 = vpop.eup %1643 }
 0x8f4   :  { %v494_v18 = vadd.f32 1.0, %v1644_v17 }
 0x8f6   :  { %1645 = vrcp.f32 %v494_v18 }
 0x903   :  { %v1646_v19 = vpop.eup %1645 }
 0x904   :  { %v500_v22 = vmul.f32 %v1646_v19, %v498_v20  ;;  %v507_v26 = vsub.f32 1.0, %v1646_v19  ;;  %v513_v30 = vmul.f32 %v1646_v19, %v1899_v52 }
 0x906   :  { %502 = vrot.lane.b32.xlu0 %v500_v22, %s1743_s7 }
 0x978   :  { %v503_v23 = vpop.permute.xlu0 %502 }
 0x979   :  { %v505_v54 = vadd.f32 %v503_v23, %v486_v9 }
 0x97b   :  { %1647 = vtanh.f32 %v505_v54 }
 0x988   :  { %v1648_v25 = vpop.eup %1647 }
 0x989   :  { %509 = vrot.lane.b32.xlu0 %v1648_v25, %s1742_s30 }
 0x9fb   :  { %v510_v27 = vpop.permute.xlu0 %509 }
 0x9fc   :  { %v512_v31 = vmul.f32 %v510_v27, %v507_v26 }
 0x9fe   :  { %v1956_v32 = vadd.f32 %v513_v30, %v512_v31 }
 0xa00   :  { %516 = vrot.lane.b32.xlu0 %v1956_v32, %s1742_s30 }
 0xa72   :  { %v517_v33 = vpop.permute.xlu0 %516 }
 0xa73   :  { %520 = vst.msk [vmem:[#allocation2 + $0x2] sm:$0x3] %vm280_vm5, %v517_v33  ;;  %1571 = vmatmul.mubr.msk.f32.vlgmr.msra.gmra.mxu0 %vm30_vm1, %v517_v33 }
 0xa74   :  { %1585 = vmatpush3.msra.mxu0 %v1774_v0  ;;  %1592 = vmatprep.mubr.msk.f32.mxu0 %vm1738_vm0, %v1737_v1 }
 0xa75   :  { %1586 = vmatprep.subr.mxu0 %v1737_v1 }
 0xa76   :  { %1587 = vmatpush3.msra.mxu0 %v1780_v2 }
 0xa77   :  { %1588 = vmatprep.subr.mxu0 %v1737_v1 }
 0xa78   :  { %1589 = vmatpush3.msra.mxu0 %v1790_v3 }
 0xa79   :  { %1590 = vmatprep.subr.mxu0 %v1737_v1 }
 0xa7a   :  { %1591 = vmatpush3.msra.mxu0 %v1799_v4 }
 0xb33   :  { %v589_v52 = vpop.f32.mrf.mxu0 }
 0xb34   :  { %v1972_v34 = vadd.f32 %v589_v52, %v1836_v13 }
 0xb35   :  { %v1572_v35 = vpop.f32.mrf.mxu0 }
 0xb36   :  { %v600_v36 = vrot.slane %v1972_v34, %v1838_v14 }
 0xb38   :  { %v601_v37 = vcombine.high %v600_v36, %v600_v36  ;;  %v608_v39 = vrot.slane %v600_v36, %v1838_v14 }
 0xb3a   :  { %v615_v40 = vrot.slane %v601_v37, %v1838_v14  ;;  %v619_v41 = vrot.slane %v608_v39, %v1830_v10 }
 0xb3c   :  { %v623_v42 = vrot.slane %v615_v40, %v1830_v10  ;;  %v626_v43 = vadd.f32 %v619_v41, %v1849_v21 }
 0xb3e   :  { %v627_v44 = vadd.f32 %v623_v42, %v1856_v24  ;;  %1649 = vtanh.f32 %v626_v43 }
 0xb40   :  { %1651 = vtanh.f32 %v627_v44 }
 0xb4b   :  { %v1650_v16 = vpop.eup %1649 }
 0xb4c   :  { %v630_v45 = vmul.f32 %v1650_v16, %v1864_v29 }
 0xb4d   :  { %v1652_v46 = vpop.eup %1651 }
 0xb4e   :  { %v632_v47 = vsel %vm30_vm1, %v630_v45, 0.0  ;;  %v631_v48 = vmul.f32 %v1652_v46, %v1864_v29  ;;  %v1499_v45 = vld [vmem:[%s2171_s0 + $0x4] sm:$0x3] }
 0xb4f   :  { %633 = vadd.xlane.f32.xlu0 %v632_v47 }
 0xb50   :  { %v635_v49 = vsel %vm30_vm1, %v631_v48, 0.0 }
 0xb51   :  { %636 = vadd.xlane.f32.xlu1 %v635_v49 }
 0xbd8   :  { %v634_v50 = vpop.xlane.xlu0 %633 }
 0xbd9   :  { %v643_v53 = vrot.slane %v634_v50, %v1870_v38 }
 0xbda   :  { %v637_v51 = vpop.xlane.xlu1 %636 }
 0xbdb   :  { %v647_v5 = vrot.slane %v637_v51, %v1870_v38 }
 0xbdd   :  { %v648_v55 = vsel %vm165_vm2, %v647_v5, %v643_v53 }
 0xbde   :  { %v650_v56 = vsel %vm168_vm3, %v648_v55, -inf }
 0xbdf   :  { %651 = vmax.xlane.f32.xlu1 %v650_v56 }
 0xc68   :  { %v652_v57 = vpop.xlane.xlu1 %651 }
 0xc69   :  { %v657_v58 = vrot.slane %v652_v57, %v1830_v10  ;;  %v661_v59 = vrot.slane %v652_v57, %v1861_v28 }
 0xc6b   :  { %v664_v60 = vsub.f32 %v634_v50, %v657_v58  ;;  %v665_v61 = vsub.f32 %v637_v51, %v661_v59 }
 0xc6d   :  { %v666_v62 = vmul.f32 1.442695, %v664_v60  ;;  %v668_v63 = vmul.f32 1.442695, %v665_v61 }
 0xc6f   :  { %1653 = vpow2.f32 %v666_v62 }
 0xc70   :  { %1655 = vpow2.f32 %v668_v63 }
 0xc7c   :  { %v1654_v6 = vpop.eup %1653 }
 0xc7d   :  { %v1656_v7 = vpop.eup %1655  ;;  %673 = vperm.xlu1 %1615, %v1654_v6  }
 0xc7e   :  { %676 = vperm.xlu0 %1616, %v1656_v7  }
 0xcf8   :  { %v674_v8 = vpop.permute.xlu1 %673 }
 0xcf9   :  { %v677_v9 = vpop.permute.xlu0 %676  ;;  %v681_v11 = vrot.slane %v674_v8, %v1870_v38  ;;  %v694_v19 = vmul.f32 %v674_v8, %v1849_v21 }
 0xcfa   :  { %v685_v12 = vrot.slane %v677_v9, %v1870_v38  ;;  %v695_v18 = vmul.f32 %v677_v9, %v1856_v24 }
 0xcfb   :  { %v696_v22 = vsel %vm215_vm4, %v694_v19, 0.0 }
 0xcfc   :  { %v686_v15 = vsel %vm165_vm2, %v685_v12, %v681_v11  ;;  %v703_v20 = vsel %vm215_vm4, %v695_v18, 0.0  ;;  %v697_v54 = vrot.slane %v696_v22, 4 }
 0xcfd   :  { %v688_v17 = vsel %vm168_vm3, %v686_v15, 0.0  ;;  %v704_v23 = vrot.slane %v703_v20, 4 }
 0xcfe   :  { %689 = vadd.xlane.f32.xlu1 %v688_v17  ;;  %v698_v27 = vadd.f32 %v697_v54, %v696_v22 }
 0xcff   :  { %v705_v25 = vadd.f32 %v704_v23, %v703_v20 }
 0xd00   :  { %v699_v31 = vrot.slane %v698_v27, 2 }
 0xd01   :  { %v706_v30 = vrot.slane %v705_v25, 2 }
 0xd02   :  { %v700_v52 = vadd.f32 %v699_v31, %v698_v27 }
 0xd03   :  { %v707_v33 = vadd.f32 %v706_v30, %v705_v25 }
 0xd04   :  { %v701_v36 = vrot.slane %v700_v52, 1 }
 0xd05   :  { %v708_v35 = vrot.slane %v707_v33, 1 }
 0xd06   :  { %v702_v41 = vadd.f32 %v701_v36, %v700_v52 }
 0xd07   :  { %v709_v39 = vadd.f32 %v708_v35, %v707_v33 }
 0xd87   :  { %v690_v26 = vpop.xlane.xlu1 %689 }
 0xd88   :  { %1657 = vrcp.f32 %v690_v26 }
 0xd95   :  { %v1658_v37 = vpop.eup %1657 }
 0xd96   :  { %v711_v40 = vrot.slane %v1658_v37, 1  ;;  %v714_v43 = vmul.f32 %v1658_v37, %v702_v41 }
 0xd98   :  { %v715_v42 = vmul.f32 %v711_v40, %v709_v39 }
 0xd9a   :  { %v720_v44 = vrot.slane %v715_v42, 7 }
 0xd9c   :  { %v721_v16 = vsel %vm165_vm2, %v720_v44, %v714_v43 }
 0xd9d   :  { %722 = vrot.lane.b32.xlu0 %v721_v16, %s1742_s30 }
 0xda1   :  { %726 = vrot.lane.b32.xlu0 %v1972_v34, %s1742_s30 }
 0xda5   :  { %736 = vrot.lane.b32.xlu0 %v1972_v34, %s1741_s29 }
 0xe0f   :  { %v723_v46 = vpop.permute.xlu0 %722 }
 0xe10   :  { %v725_v47 = vadd.f32 %v1499_v45, %v723_v46 }
 0xe13   :  { %v727_v48 = vpop.permute.xlu0 %726 }
 0xe14   :  { %v729_v49 = vadd.f32 %v727_v48, %v725_v47 }
 0xe16   :  { %v1500_v50 = vmul.f32 -1.442695, %v729_v49 }
 0xe17   :  { %v737_v55 = vpop.permute.xlu0 %736 }
 0xe18   :  { %1659 = vpow2.f32 %v1500_v50 }
 0xe25   :  { %v1660_v51 = vpop.eup %1659 }
 0xe26   :  { %v733_v53 = vadd.f32 1.0, %v1660_v51 }
 0xe28   :  { %1661 = vrcp.f32 %v733_v53 }
 0xe35   :  { %v1662_v5 = vpop.eup %1661 }
 0xe36   :  { %v739_v56 = vmul.f32 %v1662_v5, %v737_v55  ;;  %v746_v59 = vsub.f32 1.0, %v1662_v5  ;;  %v752_v61 = vmul.f32 %v1662_v5, %v1956_v32 }
 0xe38   :  { %741 = vrot.lane.b32.xlu0 %v739_v56, %s1743_s7 }
 0xeaa   :  { %v742_v57 = vpop.permute.xlu0 %741 }
 0xeab   :  { %v744_v34 = vadd.f32 %v742_v57, %v725_v47 }
 0xead   :  { %1663 = vtanh.f32 %v744_v34 }
 0xeba   :  { %v1664_v58 = vpop.eup %1663 }
 0xebb   :  { %748 = vrot.lane.b32.xlu1 %v1664_v58, %s1742_s30 }
 0xf2d   :  { %v749_v60 = vpop.permute.xlu1 %748 }
 0xf2e   :  { %v751_v62 = vmul.f32 %v749_v60, %v746_v59 }
 0xf30   :  { %v2012_v63 = vadd.f32 %v752_v61, %v751_v62 }
 0xf32   :  { %755 = vrot.lane.b32.xlu0 %v2012_v63, %s1742_s30 }
 0xfa4   :  { %v756_v6 = vpop.permute.xlu0 %755 }
 0xfa5   :  { %759 = vst.msk [vmem:[#allocation2 + $0x4] sm:$0x3] %vm280_vm5, %v756_v6  ;;  %1582 = vmatmul.mubr.msk.f32.vlgmr.msra.gmra.mxu1 %vm30_vm1, %v756_v6 }
 0xfa6   :  { %1596 = vmatpush3.msra.mxu1 %v1774_v0  ;;  %1603 = vmatprep.mubr.msk.f32.mxu1 %vm1738_vm0, %v1737_v1 }
 0xfa7   :  { %1597 = vmatprep.subr.mxu1 %v1737_v1 }
 0xfa8   :  { %1598 = vmatpush3.msra.mxu1 %v1780_v2 }
 0xfa9   :  { %1599 = vmatprep.subr.mxu1 %v1737_v1 }
 0xfaa   :  { %1600 = vmatpush3.msra.mxu1 %v1790_v3 }
 0xfab   :  { %1601 = vmatprep.subr.mxu1 %v1737_v1 }
 0xfac   :  { %1602 = vmatpush3.msra.mxu1 %v1799_v4 }
0x1065   :  { %v828_v32 = vpop.f32.mrf.mxu1 }
0x1066   :  { %v2028_v7 = vadd.f32 %v828_v32, %v1836_v13 }
0x1067   :  { %v1583_v0 = vpop.f32.mrf.mxu1 }
0x1068   :  { %v839_v8 = vrot.slane %v2028_v7, %v1838_v14 }
0x106a   :  { %v840_v9 = vcombine.high %v839_v8, %v839_v8  ;;  %v847_v11 = vrot.slane %v839_v8, %v1838_v14 }
0x106c   :  { %v854_v2 = vrot.slane %v840_v9, %v1838_v14  ;;  %v858_v12 = vrot.slane %v847_v11, %v1830_v10 }
0x106e   :  { %v862_v3 = vrot.slane %v854_v2, %v1830_v10  ;;  %v865_v1 = vadd.f32 %v858_v12, %v1849_v21  ;;  %v1502_v12 = vld [vmem:[%s2171_s0 + $0x6] sm:$0x3] }
0x1070   :  { %v866_v4 = vadd.f32 %v862_v3, %v1856_v24  ;;  %1665 = vtanh.f32 %v865_v1 }
0x1072   :  { %1667 = vtanh.f32 %v866_v4 }
0x107d   :  { %v1666_v15 = vpop.eup %1665 }
0x107e   :  { %v869_v17 = vmul.f32 %v1666_v15, %v1864_v29 }
0x107f   :  { %v1668_v18 = vpop.eup %1667 }
0x1080   :  { %v871_v19 = vsel %vm30_vm1, %v869_v17, 0.0  ;;  %v870_v20 = vmul.f32 %v1668_v18, %v1864_v29 }
0x1081   :  { %872 = vadd.xlane.f32.xlu0 %v871_v19 }
0x1082   :  { %v874_v22 = vsel %vm30_vm1, %v870_v20, 0.0 }
0x1083   :  { %875 = vadd.xlane.f32.xlu1 %v874_v22 }
0x110a   :  { %v873_v23 = vpop.xlane.xlu0 %872 }
0x110b   :  { %v882_v25 = vrot.slane %v873_v23, %v1870_v38 }
0x110c   :  { %v876_v54 = vpop.xlane.xlu1 %875 }
0x110d   :  { %v886_v26 = vrot.slane %v876_v54, %v1870_v38 }
0x110f   :  { %v887_v27 = vsel %vm165_vm2, %v886_v26, %v882_v25 }
0x1110   :  { %v889_v30 = vsel %vm168_vm3, %v887_v27, -inf }
0x1111   :  { %890 = vmax.xlane.f32.xlu0 %v889_v30 }
0x119a   :  { %v891_v31 = vpop.xlane.xlu0 %890 }
0x119b   :  { %v896_v33 = vrot.slane %v891_v31, %v1830_v10  ;;  %v900_v52 = vrot.slane %v891_v31, %v1861_v28 }
0x119d   :  { %v903_v35 = vsub.f32 %v873_v23, %v896_v33  ;;  %v904_v36 = vsub.f32 %v876_v54, %v900_v52 }
0x119f   :  { %v905_v37 = vmul.f32 1.442695, %v903_v35  ;;  %v907_v39 = vmul.f32 1.442695, %v904_v36 }
0x11a1   :  { %1669 = vpow2.f32 %v905_v37 }
0x11a2   :  { %1671 = vpow2.f32 %v907_v39 }
0x11ae   :  { %v1670_v40 = vpop.eup %1669 }
0x11af   :  { %v1672_v41 = vpop.eup %1671  ;;  %912 = vperm.xlu0 %1616, %v1670_v40  }
0x11b0   :  { %915 = vperm.xlu1 %1615, %v1672_v41  }
0x122a   :  { %v913_v42 = vpop.permute.xlu0 %912 }
0x122b   :  { %v916_v43 = vpop.permute.xlu1 %915  ;;  %v920_v44 = vrot.slane %v913_v42, %v1870_v38  ;;  %v933_v48 = vmul.f32 %v913_v42, %v1849_v21 }
0x122c   :  { %v924_v16 = vrot.slane %v916_v43, %v1870_v38  ;;  %v934_v47 = vmul.f32 %v916_v43, %v1856_v24 }
0x122d   :  { %v935_v50 = vsel %vm215_vm4, %v933_v48, 0.0 }
0x122e   :  { %v925_v45 = vsel %vm165_vm2, %v924_v16, %v920_v44  ;;  %v942_v49 = vsel %vm215_vm4, %v934_v47, 0.0  ;;  %v936_v53 = vrot.slane %v935_v50, 4 }
0x122f   :  { %v927_v46 = vsel %vm168_vm3, %v925_v45, 0.0  ;;  %v943_v51 = vrot.slane %v942_v49, 4 }
0x1230   :  { %928 = vadd.xlane.f32.xlu0 %v927_v46  ;;  %v937_v56 = vadd.f32 %v936_v53, %v935_v50 }
0x1231   :  { %v944_v5 = vadd.f32 %v943_v51, %v942_v49 }
0x1232   :  { %v938_v34 = vrot.slane %v937_v56, 2 }
0x1233   :  { %v945_v57 = vrot.slane %v944_v5, 2 }
0x1234   :  { %v939_v59 = vadd.f32 %v938_v34, %v937_v56 }
0x1235   :  { %v946_v58 = vadd.f32 %v945_v57, %v944_v5 }
0x1236   :  { %v940_v61 = vrot.slane %v939_v59, 1 }
0x1237   :  { %v947_v60 = vrot.slane %v946_v58, 1 }
0x1238   :  { %v941_v0 = vadd.f32 %v940_v61, %v939_v59 }
0x1239   :  { %v948_v6 = vadd.f32 %v947_v60, %v946_v58 }
0x12b9   :  { %v929_v55 = vpop.xlane.xlu0 %928 }
0x12ba   :  { %1673 = vrcp.f32 %v929_v55 }
0x12c7   :  { %v1674_v62 = vpop.eup %1673 }
0x12c8   :  { %v950_v32 = vrot.slane %v1674_v62, 1  ;;  %v953_v9 = vmul.f32 %v1674_v62, %v941_v0 }
0x12ca   :  { %v954_v8 = vmul.f32 %v950_v32, %v948_v6 }
0x12cc   :  { %v959_v11 = vrot.slane %v954_v8, 7 }
0x12ce   :  { %v960_v2 = vsel %vm165_vm2, %v959_v11, %v953_v9 }
0x12cf   :  { %961 = vrot.lane.b32.xlu1 %v960_v2, %s1742_s30 }
0x12d3   :  { %965 = vrot.lane.b32.xlu1 %v2028_v7, %s1742_s30 }
0x12d7   :  { %975 = vrot.lane.b32.xlu1 %v2028_v7, %s1741_s29 }
0x1341   :  { %v962_v3 = vpop.permute.xlu1 %961 }
0x1342   :  { %v964_v1 = vadd.f32 %v1502_v12, %v962_v3 }
0x1345   :  { %v966_v4 = vpop.permute.xlu1 %965 }
0x1346   :  { %v968_v15 = vadd.f32 %v966_v4, %v964_v1 }
0x1348   :  { %v1503_v17 = vmul.f32 -1.442695, %v968_v15 }
0x1349   :  { %v976_v22 = vpop.permute.xlu1 %975 }
0x134a   :  { %1675 = vpow2.f32 %v1503_v17 }
0x1357   :  { %v1676_v18 = vpop.eup %1675 }
0x1358   :  { %v972_v19 = vadd.f32 1.0, %v1676_v18 }
0x135a   :  { %1677 = vrcp.f32 %v972_v19 }
0x1367   :  { %v1678_v20 = vpop.eup %1677 }
0x1368   :  { %v978_v23 = vmul.f32 %v1678_v20, %v976_v22  ;;  %v985_v26 = vsub.f32 1.0, %v1678_v20  ;;  %v991_v30 = vmul.f32 %v1678_v20, %v2012_v63 }
0x136a   :  { %980 = vrot.lane.b32.xlu1 %v978_v23, %s1743_s7 }
0x13dc   :  { %v981_v54 = vpop.permute.xlu1 %980 }
0x13dd   :  { %v983_v7 = vadd.f32 %v981_v54, %v964_v1 }
0x13df   :  { %1679 = vtanh.f32 %v983_v7 }
0x13ec   :  { %v1680_v25 = vpop.eup %1679 }
0x13ed   :  { %987 = vrot.lane.b32.xlu1 %v1680_v25, %s1742_s30 }
0x145f   :  { %v988_v27 = vpop.permute.xlu1 %987 }
0x1460   :  { %v990_v31 = vmul.f32 %v988_v27, %v985_v26 }
0x1462   :  { %v2068_v33 = vadd.f32 %v991_v30, %v990_v31 }
0x1464   :  { %994 = vrot.lane.b32.xlu1 %v2068_v33, %s1742_s30 }
0x14d6   :  { %v995_v52 = vpop.permute.xlu1 %994 }
0x14d7   :  { %998 = vst.msk [vmem:[#allocation2 + $0x6] sm:$0x3] %vm280_vm5, %v995_v52  ;;  %1593 = vmatmul.mubr.msk.f32.vlgmr.msra.gmra.mxu0 %vm30_vm1, %v995_v52 }
0x1597   :  { %v1067_v35 = vpop.f32.mrf.mxu0 }
0x1598   :  { %v2075_v36 = vadd.f32 %v1067_v35, %v1836_v13 }
0x1599   :  { %v1594_v37 = vpop.f32.mrf.mxu0 }
0x159a   :  { %v1078_v39 = vrot.slane %v2075_v36, %v1838_v14 }
0x159c   :  { %v1079_v63 = vcombine.high %v1078_v39, %v1078_v39  ;;  %v1086_v40 = vrot.slane %v1078_v39, %v1838_v14 }
0x159e   :  { %v1093_v41 = vrot.slane %v1079_v63, %v1838_v14  ;;  %v1097_v42 = vrot.slane %v1086_v40, %v1830_v10  ;;  %v1505_v40 = vld [vmem:[%s2171_s0 + $0x8] sm:$0x3] }
0x15a0   :  { %v1101_v43 = vrot.slane %v1093_v41, %v1830_v10  ;;  %v1104_v44 = vadd.f32 %v1097_v42, %v1849_v21 }
0x15a2   :  { %v1105_v16 = vadd.f32 %v1101_v43, %v1856_v24  ;;  %1681 = vtanh.f32 %v1104_v44 }
0x15a4   :  { %1683 = vtanh.f32 %v1105_v16 }
0x15af   :  { %v1682_v45 = vpop.eup %1681 }
0x15b0   :  { %v1108_v46 = vmul.f32 %v1682_v45, %v1864_v29 }
0x15b1   :  { %v1684_v47 = vpop.eup %1683 }
0x15b2   :  { %v1110_v48 = vsel %vm30_vm1, %v1108_v46, 0.0  ;;  %v1109_v49 = vmul.f32 %v1684_v47, %v1864_v29 }
0x15b3   :  { %1111 = vadd.xlane.f32.xlu0 %v1110_v48 }
0x15b4   :  { %v1113_v50 = vsel %vm30_vm1, %v1109_v49, 0.0 }
0x15b5   :  { %1114 = vadd.xlane.f32.xlu1 %v1113_v50 }
0x163c   :  { %v1112_v51 = vpop.xlane.xlu0 %1111 }
0x163d   :  { %v1121_v5 = vrot.slane %v1112_v51, %v1870_v38 }
0x163e   :  { %v1115_v53 = vpop.xlane.xlu1 %1114 }
0x163f   :  { %v1125_v55 = vrot.slane %v1115_v53, %v1870_v38 }
0x1641   :  { %v1126_v56 = vsel %vm165_vm2, %v1125_v55, %v1121_v5 }
0x1642   :  { %v1128_v57 = vsel %vm168_vm3, %v1126_v56, -inf }
0x1643   :  { %1129 = vmax.xlane.f32.xlu0 %v1128_v57 }
0x16cc   :  { %v1130_v34 = vpop.xlane.xlu0 %1129 }
0x16cd   :  { %v1135_v58 = vrot.slane %v1130_v34, %v1830_v10  ;;  %v1139_v59 = vrot.slane %v1130_v34, %v1861_v28 }
0x16cf   :  { %v1142_v60 = vsub.f32 %v1112_v51, %v1135_v58  ;;  %v1143_v61 = vsub.f32 %v1115_v53, %v1139_v59 }
0x16d1   :  { %v1144_v62 = vmul.f32 1.442695, %v1142_v60  ;;  %v1146_v6 = vmul.f32 1.442695, %v1143_v61 }
0x16d3   :  { %1685 = vpow2.f32 %v1144_v62 }
0x16d4   :  { %1687 = vpow2.f32 %v1146_v6 }
0x16e0   :  { %v1686_v32 = vpop.eup %1685 }
0x16e1   :  { %1151 = vperm.xlu0 %1616, %v1686_v32   ;;  %v1688_v0 = vpop.eup %1687 }
0x16e5   :  { %1154 = vperm.xlu0 %1616, %v1688_v0  }
0x175c   :  { %v1152_v8 = vpop.permute.xlu0 %1151 }
0x175d   :  { %v1159_v11 = vrot.slane %v1152_v8, %v1870_v38  ;;  %v1172_v4 = vmul.f32 %v1152_v8, %v1849_v21  ;;  %v1713_v8 = vld [vmem:[%s2173_s2] sm:$0xff] }
0x175f   :  { %v1174_v17 = vsel %vm215_vm4, %v1172_v4, 0.0 }
0x1760   :  { %v1155_v9 = vpop.permute.xlu0 %1154  ;;  %v1175_v19 = vrot.slane %v1174_v17, 4 }
0x1761   :  { %v1163_v2 = vrot.slane %v1155_v9, %v1870_v38  ;;  %v1173_v1 = vmul.f32 %v1155_v9, %v1856_v24 }
0x1762   :  { %v1176_v23 = vadd.f32 %v1175_v19, %v1174_v17 }
0x1763   :  { %v1164_v12 = vsel %vm165_vm2, %v1163_v2, %v1159_v11  ;;  %v1181_v15 = vsel %vm215_vm4, %v1173_v1, 0.0 }
0x1764   :  { %v1166_v3 = vsel %vm168_vm3, %v1164_v12, 0.0  ;;  %v1182_v18 = vrot.slane %v1181_v15, 4  ;;  %v1177_v7 = vrot.slane %v1176_v23, 2 }
0x1765   :  { %1167 = vadd.xlane.f32.xlu0 %v1166_v3 }
0x1766   :  { %v1183_v20 = vadd.f32 %v1182_v18, %v1181_v15  ;;  %v1178_v26 = vadd.f32 %v1177_v7, %v1176_v23 }
0x1768   :  { %v1184_v54 = vrot.slane %v1183_v20, 2  ;;  %v1179_v30 = vrot.slane %v1178_v26, 1 }
0x176a   :  { %v1185_v25 = vadd.f32 %v1184_v54, %v1183_v20  ;;  %v1180_v21 = vadd.f32 %v1179_v30, %v1178_v26 }
0x176c   :  { %v1186_v27 = vrot.slane %v1185_v25, 1 }
0x176e   :  { %v1187_v24 = vadd.f32 %v1186_v27, %v1185_v25 }
0x17ee   :  { %v1168_v22 = vpop.xlane.xlu0 %1167 }
0x17ef   :  { %1689 = vrcp.f32 %v1168_v22 }
0x17fc   :  { %v1690_v31 = vpop.eup %1689 }
0x17fd   :  { %v1189_v52 = vrot.slane %v1690_v31, 1  ;;  %v1192_v37 = vmul.f32 %v1690_v31, %v1180_v21 }
0x17ff   :  { %v1193_v35 = vmul.f32 %v1189_v52, %v1187_v24 }
0x1801   :  { %v1198_v39 = vrot.slane %v1193_v35, 7 }
0x1803   :  { %v1199_v63 = vsel %vm165_vm2, %v1198_v39, %v1192_v37 }
0x1804   :  { %1200 = vrot.lane.b32.xlu1 %v1199_v63, %s1742_s30 }
0x1808   :  { %1204 = vrot.lane.b32.xlu1 %v2075_v36, %s1742_s30 }
0x180c   :  { %1214 = vrot.lane.b32.xlu1 %v2075_v36, %s1741_s29 }
0x1876   :  { %v1201_v41 = vpop.permute.xlu1 %1200 }
0x1877   :  { %v1203_v42 = vadd.f32 %v1505_v40, %v1201_v41 }
0x187a   :  { %v1205_v43 = vpop.permute.xlu1 %1204 }
0x187b   :  { %v1207_v44 = vadd.f32 %v1205_v43, %v1203_v42 }
0x187d   :  { %v1506_v16 = vmul.f32 -1.442695, %v1207_v44 }
0x187e   :  { %v1215_v48 = vpop.permute.xlu1 %1214 }
0x187f   :  { %1691 = vpow2.f32 %v1506_v16 }
0x188c   :  { %v1692_v45 = vpop.eup %1691 }
0x188d   :  { %v1211_v46 = vadd.f32 1.0, %v1692_v45 }
0x188f   :  { %1693 = vrcp.f32 %v1211_v46 }
0x189c   :  { %v1694_v47 = vpop.eup %1693 }
0x189d   :  { %v1217_v49 = vmul.f32 %v1694_v47, %v1215_v48  ;;  %v1224_v53 = vsub.f32 1.0, %v1694_v47  ;;  %v1230_v55 = vmul.f32 %v1694_v47, %v2068_v33 }
0x189f   :  { %1219 = vrot.lane.b32.xlu1 %v1217_v49, %s1743_s7 }
0x1911   :  { %v1220_v50 = vpop.permute.xlu1 %1219 }
0x1912   :  { %v1222_v36 = vadd.f32 %v1220_v50, %v1203_v42 }
0x1914   :  { %1695 = vtanh.f32 %v1222_v36 }
0x1921   :  { %v1696_v51 = vpop.eup %1695 }
0x1922   :  { %1226 = vrot.lane.b32.xlu0 %v1696_v51, %s1742_s30 }
0x1994   :  { %v1227_v5 = vpop.permute.xlu0 %1226 }
0x1995   :  { %v1229_v56 = vmul.f32 %v1227_v5, %v1224_v53 }
0x1997   :  { %v2115_v57 = vadd.f32 %v1230_v55, %v1229_v56 }
0x1999   :  { %1233 = vrot.lane.b32.xlu1 %v2115_v57, %s1742_s30 }
0x1a0b   :  { %v1234_v34 = vpop.permute.xlu1 %1233 }
0x1a0c   :  { %1237 = vst.msk [vmem:[#allocation2 + $0x8] sm:$0x3] %vm280_vm5, %v1234_v34  ;;  %1604 = vmatmul.mubr.msk.f32.vlgmr.msra.gmra.mxu1 %vm30_vm1, %v1234_v34 }
0x1acc   :  { %v1306_v58 = vpop.f32.mrf.mxu1 }
0x1acd   :  { %v2122_v59 = vadd.f32 %v1306_v58, %v1836_v13  ;;  %v1714_v13 = vld [vmem:[%s2173_s2 + $0x8] sm:$0xff] }
0x1ace   :  { %v1605_v60 = vpop.f32.mrf.mxu1  ;;  %v1508_v58 = vld [vmem:[%s2171_s0 + $0xa] sm:$0x3]  ;;  %s1744_s0 = smov [#allocation2]  }
0x1acf   :  { %v1317_v61 = vrot.slane %v2122_v59, %v1838_v14  ;;  %s1482_s21 = sshll.u32 %s1744_s0, 4  ;;  %s1483_s21 = int_to_ptr.vmem [resolvable:$true] %s1482_s21 }
0x1ad0   :  { %s1715_s22 = scalar_lea.vmem %s1483_s21, 192  ;;  %p1720_p1 = scmp.lt.s32.totalorder %s1483_s21, %s1483_s21 }
0x1ad1   :  { %v1318_v33 = vcombine.high %v1317_v61, %v1317_v61  ;;  %v1325_v62 = vrot.slane %v1317_v61, %v1838_v14  ;;  %p1716_p0 = scmp.ne.s32.totalorder %s1483_s21, %s1715_s22  ;;  %p1721_p2 = scmp.lt.s32.totalorder %s1715_s22, %s1715_s22 }
0x1ad3   :  { %v1332_v6 = vrot.slane %v1318_v33, %v1838_v14  ;;  %v1336_v32 = vrot.slane %v1325_v62, %v1830_v10  ;;  %p1722_p3 = por %p1721_p2, %p1720_p1 }
0x1ad5   :  { %v1340_v0 = vrot.slane %v1332_v6, %v1830_v10  ;;  %v1343_v9 = vadd.f32 %v1713_v8, %v1336_v32  ;;  %p1723_p4 = pnand %p1722_p3, %p1716_p0 }
0x1ad7   :  { %v1344_v11 = vadd.f32 %v1714_v13, %v1340_v0  ;;  %1697 = vtanh.f32 %v1343_v9 }
0x1ad9   :  { %1699 = vtanh.f32 %v1344_v11 }
0x1ae4   :  { %v1698_v2 = vpop.eup %1697 }
0x1ae5   :  { %v1347_v12 = vmul.f32 %v1698_v2, %v1864_v29 }
0x1ae6   :  { %v1700_v14 = vpop.eup %1699 }
0x1ae7   :  { %v1349_v3 = vsel %vm30_vm1, %v1347_v12, 0.0  ;;  %v1348_v1 = vmul.f32 %v1700_v14, %v1864_v29 }
0x1ae8   :  { %1350 = vadd.xlane.f32.xlu1 %v1349_v3 }
0x1ae9   :  { %v1352_v4 = vsel %vm30_vm1, %v1348_v1, 0.0 }
0x1aea   :  { %1353 = vadd.xlane.f32.xlu0 %v1352_v4 }
0x1b71   :  { %v1351_v15 = vpop.xlane.xlu1 %1350 }
0x1b72   :  { %v1360_v18 = vrot.slane %v1351_v15, %v1870_v38 }
0x1b73   :  { %v1354_v17 = vpop.xlane.xlu0 %1353 }
0x1b74   :  { %v1364_v19 = vrot.slane %v1354_v17, %v1870_v38 }
0x1b76   :  { %v1365_v20 = vsel %vm165_vm2, %v1364_v19, %v1360_v18 }
0x1b77   :  { %v1367_v22 = vsel %vm168_vm3, %v1365_v20, -inf }
0x1b78   :  { %1368 = vmax.xlane.f32.xlu1 %v1367_v22 }
0x1c01   :  { %v1369_v23 = vpop.xlane.xlu1 %1368 }
0x1c02   :  { %v1374_v54 = vrot.slane %v1369_v23, %v1830_v10  ;;  %v1378_v29 = vrot.slane %v1369_v23, %v1861_v28 }
0x1c04   :  { %v1381_v7 = vsub.f32 %v1351_v15, %v1374_v54  ;;  %v1382_v25 = vsub.f32 %v1354_v17, %v1378_v29 }
0x1c06   :  { %v1383_v26 = vmul.f32 1.442695, %v1381_v7  ;;  %v1385_v27 = vmul.f32 1.442695, %v1382_v25 }
0x1c08   :  { %1701 = vpow2.f32 %v1383_v26 }
0x1c09   :  { %1703 = vpow2.f32 %v1385_v27 }
0x1c15   :  { %v1702_v30 = vpop.eup %1701 }
0x1c16   :  { %v1704_v31 = vpop.eup %1703  ;;  %1390 = vperm.xlu1 %1615, %v1702_v30  }
0x1c17   :  { %1393 = vperm.xlu0 %1616, %v1704_v31  }
0x1c91   :  { %v1391_v24 = vpop.permute.xlu1 %1390 }
0x1c92   :  { %v1394_v52 = vpop.permute.xlu0 %1393  ;;  %v1398_v21 = vrot.slane %v1391_v24, %v1870_v38  ;;  %v1411_v39 = vmul.f32 %v1713_v8, %v1391_v24 }
0x1c93   :  { %v1402_v35 = vrot.slane %v1394_v52, %v1870_v38  ;;  %v1412_v37 = vmul.f32 %v1714_v13, %v1394_v52 }
0x1c94   :  { %v1413_v40 = vsel %vm215_vm4, %v1411_v39, 0.0 }
0x1c95   :  { %v1403_v10 = vsel %vm165_vm2, %v1402_v35, %v1398_v21  ;;  %v1420_v63 = vsel %vm215_vm4, %v1412_v37, 0.0  ;;  %v1414_v42 = vrot.slane %v1413_v40, 4 }
0x1c96   :  { %v1405_v28 = vsel %vm168_vm3, %v1403_v10, 0.0  ;;  %v1421_v41 = vrot.slane %v1420_v63, 4 }
0x1c97   :  { %1406 = vadd.xlane.f32.xlu1 %v1405_v28  ;;  %v1415_v16 = vadd.f32 %v1414_v42, %v1413_v40 }
0x1c98   :  { %v1422_v43 = vadd.f32 %v1421_v41, %v1420_v63 }
0x1c99   :  { %v1416_v46 = vrot.slane %v1415_v16, 2 }
0x1c9a   :  { %v1423_v45 = vrot.slane %v1422_v43, 2 }
0x1c9b   :  { %v1417_v47 = vadd.f32 %v1416_v46, %v1415_v16 }
0x1c9c   :  { %v1424_v38 = vadd.f32 %v1423_v45, %v1422_v43 }
0x1c9d   :  { %v1418_v49 = vrot.slane %v1417_v47, 1 }
0x1c9e   :  { %v1425_v48 = vrot.slane %v1424_v38, 1 }
0x1c9f   :  { %v1419_v53 = vadd.f32 %v1418_v49, %v1417_v47 }
0x1ca0   :  { %v1426_v36 = vadd.f32 %v1425_v48, %v1424_v38 }
0x1d20   :  { %v1407_v44 = vpop.xlane.xlu1 %1406 }
0x1d21   :  { %1705 = vrcp.f32 %v1407_v44 }
0x1d2e   :  { %v1706_v50 = vpop.eup %1705 }
0x1d2f   :  { %v1428_v51 = vrot.slane %v1706_v50, 1  ;;  %v1431_v55 = vmul.f32 %v1706_v50, %v1419_v53 }
0x1d31   :  { %v1432_v5 = vmul.f32 %v1428_v51, %v1426_v36 }
0x1d33   :  { %v1437_v56 = vrot.slane %v1432_v5, 7 }
0x1d35   :  { %v1438_v34 = vsel %vm165_vm2, %v1437_v56, %v1431_v55 }
0x1d36   :  { %1439 = vrot.lane.b32.xlu0 %v1438_v34, %s1742_s30 }
0x1d3a   :  { %1443 = vrot.lane.b32.xlu0 %v2122_v59, %s1742_s30 }
0x1d3e   :  { %1453 = vrot.lane.b32.xlu0 %v2122_v59, %s1741_s29 }
0x1da8   :  { %v1440_v60 = vpop.permute.xlu0 %1439 }
0x1da9   :  { %v1442_v61 = vadd.f32 %v1508_v58, %v1440_v60 }
0x1dac   :  { %v1444_v33 = vpop.permute.xlu0 %1443 }
0x1dad   :  { %v1446_v62 = vadd.f32 %v1444_v33, %v1442_v61 }
0x1daf   :  { %v1509_v6 = vmul.f32 -1.442695, %v1446_v62 }
0x1db0   :  { %v1454_v9 = vpop.permute.xlu0 %1453 }
0x1db1   :  { %1707 = vpow2.f32 %v1509_v6 }
0x1dbe   :  { %v1708_v32 = vpop.eup %1707 }
0x1dbf   :  { %v1450_v0 = vadd.f32 1.0, %v1708_v32 }
0x1dc1   :  { %1709 = vrcp.f32 %v1450_v0 }
0x1dce   :  { %v1710_v8 = vpop.eup %1709 }
0x1dcf   :  { %v1456_v13 = vmul.f32 %v1710_v8, %v1454_v9  ;;  %v1463_v12 = vsub.f32 1.0, %v1710_v8  ;;  %v1469_v3 = vmul.f32 %v1710_v8, %v2115_v57 }
0x1dd1   :  { %1458 = vrot.lane.b32.xlu0 %v1456_v13, %s1743_s7 }
0x1e43   :  { %v1459_v11 = vpop.permute.xlu0 %1458 }
0x1e44   :  { %v1461_v59 = vadd.f32 %v1459_v11, %v1442_v61 }
0x1e46   :  { %1711 = vtanh.f32 %v1461_v59 }
0x1e53   :  { %v1712_v2 = vpop.eup %1711 }
0x1e54   :  { %1465 = vrot.lane.b32.xlu0 %v1712_v2, %s1742_s30 }
0x1ec6   :  { %v1466_v14 = vpop.permute.xlu0 %1465 }
0x1ec7   :  { %v1468_v1 = vmul.f32 %v1466_v14, %v1463_v12 }
0x1ec9   :  { %v1470_v4 = vadd.f32 %v1469_v3, %v1468_v1 }
0x1ecb   :  { %1472 = vrot.lane.b32.xlu0 %v1470_v4, %s1742_s30 }
0x1f3d   :  { %v1473_v15 = vpop.permute.xlu0 %1472 }
0x1f3e   :  { %1476 = vst.msk [vmem:[#allocation2 + $0xa] sm:$0x3] %vm280_vm5, %v1473_v15 }
0x1f3f   :  { %1726 = shalt.err (!%p1723_p4)
}
0x1f40   :  { %s1745_s23 = smov 2  }
0x1f41   :  { %1488 = dma.vmem_to_hbm [thread:$0]  %s1483_s21, 192, %s2175_s4, [#allocation3], %s1741_s29, %s1741_s29, %s1745_s23  }
0x1f42   :  { %1735 = dma.done.wait [#allocation3], 192  }
0x1f43   :  { %1736 = vsyncadd [#allocation3], 4294967104 }
0x1f44   :  { %1492 = vsyncpa [#allocation3], 1 }

</bundles_post_ra>
